<compile_context>
chip_gen: v7x
topology: tpu7x:2x2x1
jax: 0.10.0
libtpu: 0.0.40
codegen_flags: <defaults>
</compile_context>

<pallas_src>
import functools

import jax
import jax.numpy as jnp
from jax.experimental import pallas as pl
from jax.experimental.pallas import tpu as pltpu

INPUT_SIZE = 4
HIDDEN_SIZE = 64
NUM_LAYERS = 2
OUTPUT_SIZE = 1
SUBLANES = 8  # pad batch to one sublane group


def _sigmoid1(z):
    # sigmoid(z) == 0.5 * tanh(0.5 * z) + 0.5 : single EUP push + VPU ops.
    return 0.5 * jnp.tanh(0.5 * z) + 0.5


def fire_lstm_kernel(x_ref,
                     wih0_ref, whh0_ref, b0_ref,
                     w1ih_ref, w1hh_ref, b1_ref,
                     fc1w_ref, fc1b_ref,
                     fc2w_ref, fc2b_ref,
                     fc3w_ref, fc3b_ref,
                     out_ref,
                     zx0_ref,            # VMEM scratch (T*B, 4H) f32
                     *, T, B):
    H = whh0_ref.shape[0]          # whh0_T has shape (H, 4H)
    H4 = 4 * H

    # ---- Hoisted layer-0 input projection for all T timesteps (1 matmul),
    #      bias folded in, stashed in VMEM scratch (not pinned in vregs). ----
    zx0_ref[...] = (jnp.dot(x_ref[...], wih0_ref[...],
                            preferred_element_type=jnp.float32)
                    + b0_ref[...])                          # (T*B, 4H) f32

    def gates(z):
        # Gate order (i, f, o, g): one tanh-based sigmoid over the 3H prefix
        # and one tanh over the trailing H band (2 EUP pushes per cell).
        s = _sigmoid1(z[:, 0:3 * H])
        g = jnp.tanh(z[:, 3 * H:H4])
        return s[:, 0:H], s[:, H:2 * H], s[:, 2 * H:3 * H], g

    h0 = jnp.zeros((B, H), jnp.float32)
    c0 = jnp.zeros((B, H), jnp.float32)
    h1 = jnp.zeros((B, H), jnp.float32)
    c1 = jnp.zeros((B, H), jnp.float32)

    # Fully-unrolled T-step recurrence (T is small & static). Weights are
    # re-read from VMEM refs inside the loop instead of being pinned in vregs
    # across the whole unrolled body.
    for t in range(T):
        # Layer-1 recurrent half: depends only on the PREVIOUS step's h1, so
        # the scheduler can overlap this matmul with layer-0 below.
        r1 = (jnp.dot(h1.astype(jnp.bfloat16), w1hh_ref[...],
                      preferred_element_type=jnp.float32)
              + b1_ref[...])                                # (B, 4H)

        # ---- layer 0: input projection hoisted; single K=H recurrent matmul ----
        z0 = (jnp.dot(h0.astype(jnp.bfloat16), whh0_ref[...],
                      preferred_element_type=jnp.float32)
              + zx0_ref[t * B:(t + 1) * B, :])
        i0, f0, o0, g0 = gates(z0)
        c0 = f0 * c0 + i0 * g0
        h0 = o0 * jnp.tanh(c0)

        # ---- layer 1: only the K=H h0 matmul remains on the serial chain ----
        z1 = (jnp.dot(h0.astype(jnp.bfloat16), w1ih_ref[...],
                      preferred_element_type=jnp.float32)
              + r1)
        i1, f1, o1, g1 = gates(z1)
        c1 = f1 * c1 + i1 * g1
        h1 = o1 * jnp.tanh(c1)
        # TODO(synk): inter-layer dropout (p=0.2) is identity at inference; omitted.

    # ---- MLP head on lstm_out[:, -1, :] == final h of top layer (f32) ----
    y = jnp.dot(h1, fc1w_ref[...], preferred_element_type=jnp.float32) + fc1b_ref[...]
    y = jnp.maximum(y, 0.0)
    # TODO(synk): head dropout (p=0.2) is identity at inference; omitted.
    y = jnp.dot(y, fc2w_ref[...], preferred_element_type=jnp.float32) + fc2b_ref[...]
    y = jnp.maximum(y, 0.0)
    y = jnp.dot(y, fc3w_ref[...], preferred_element_type=jnp.float32) + fc3b_ref[...]
    out_ref[...] = _sigmoid1(y)


def init_raw_params(key):
    """Deterministic PyTorch-style uniform(-1/sqrt(fan), 1/sqrt(fan)) init,
    in the original PyTorch layout (gate order i, f, g, o)."""
    H, D = HIDDEN_SIZE, INPUT_SIZE
    ks = list(jax.random.split(key, 16))
    u = lambda k, shape, bound: jax.random.uniform(
        k, shape, jnp.float32, minval=-bound, maxval=bound)

    lb = 1.0 / (H ** 0.5)
    raw = dict(
        w_ih0=u(ks[0], (4 * H, D), lb), w_hh0=u(ks[1], (4 * H, H), lb),
        b_ih0=u(ks[2], (4 * H,), lb), b_hh0=u(ks[3], (4 * H,), lb),
        w_ih1=u(ks[4], (4 * H, H), lb), w_hh1=u(ks[5], (4 * H, H), lb),
        b_ih1=u(ks[6], (4 * H,), lb), b_hh1=u(ks[7], (4 * H,), lb),
        fc1_w=u(ks[8], (32, H), 1.0 / (H ** 0.5)),
        fc1_b=u(ks[9], (32,), 1.0 / (H ** 0.5)),
        fc2_w=u(ks[10], (16, 32), 1.0 / (32.0 ** 0.5)),
        fc2_b=u(ks[11], (16,), 1.0 / (32.0 ** 0.5)),
        fc3_w=u(ks[12], (OUTPUT_SIZE, 16), 1.0 / (16.0 ** 0.5)),
        fc3_b=u(ks[13], (OUTPUT_SIZE,), 1.0 / (16.0 ** 0.5)),
    )
    return raw


def pack_params(raw):
    """Transpose / permute weights for the kernel.

    Gate columns are reordered i,f,g,o -> i,f,o,g; biases are summed
    (b_ih + b_hh) and kept as (1, 4H) (broadcast happens inside the kernel,
    so packing is independent of batch size). Matmul weights -> bf16.
    """
    H = HIDDEN_SIZE
    perm = jnp.concatenate([jnp.arange(0, H), jnp.arange(H, 2 * H),
                            jnp.arange(3 * H, 4 * H), jnp.arange(2 * H, 3 * H)])
    r_rows = lambda w: w[perm, :]      # rows of (4H, K) PyTorch weights
    r_vec = lambda b: b[perm]

    wih0_T = r_rows(raw["w_ih0"]).T.astype(jnp.bfloat16)            # (D, 4H)
    whh0_T = r_rows(raw["w_hh0"]).T.astype(jnp.bfloat16)            # (H, 4H)
    b0 = (r_vec(raw["b_ih0"]) + r_vec(raw["b_hh0"])).reshape(1, 4 * H)
    w1ih_T = r_rows(raw["w_ih1"]).T.astype(jnp.bfloat16)            # (H, 4H)
    w1hh_T = r_rows(raw["w_hh1"]).T.astype(jnp.bfloat16)            # (H, 4H)
    b1 = (r_vec(raw["b_ih1"]) + r_vec(raw["b_hh1"])).reshape(1, 4 * H)

    return dict(
        wih0_T=wih0_T, whh0_T=whh0_T, b0=b0.astype(jnp.float32),
        w1ih_T=w1ih_T, w1hh_T=w1hh_T, b1=b1.astype(jnp.float32),
        fc1w_T=raw["fc1_w"].T, fc1b=raw["fc1_b"].reshape(1, -1),
        fc2w_T=raw["fc2_w"].T, fc2b=raw["fc2_b"].reshape(1, -1),
        fc3w_T=raw["fc3_w"].T, fc3b=raw["fc3_b"].reshape(1, -1),
    )


def fire_spread_lstm_forward(x, p):
    """x: (B, T, D_in) batch_first, matching the PyTorch module."""
    B, T, D = x.shape
    # Pad batch to a full sublane group so MXU rows / vreg sublanes aren't
    # mostly idle; padded rows are sliced off the output.
    B_pad = max(SUBLANES, ((B + SUBLANES - 1) // SUBLANES) * SUBLANES)
    if B_pad != B:
        x = jnp.concatenate(
            [x, jnp.zeros((B_pad - B, T, D), x.dtype)], axis=0)
    # Time-major, flattened to (T*B_pad, D); bf16 operand for the MXU.
    x_2d = jnp.transpose(x, (1, 0, 2)).reshape(T * B_pad, D).astype(jnp.bfloat16)
    args = (x_2d,
            p["wih0_T"], p["whh0_T"], p["b0"],
            p["w1ih_T"], p["w1hh_T"], p["b1"],
            p["fc1w_T"], p["fc1b"],
            p["fc2w_T"], p["fc2b"],
            p["fc3w_T"], p["fc3b"])
    kernel = functools.partial(fire_lstm_kernel, T=T, B=B_pad)
    out = pl.pallas_call(
        kernel,
        out_shape=jax.ShapeDtypeStruct((B_pad, OUTPUT_SIZE), jnp.float32),
        in_specs=[pl.BlockSpec(memory_space=pltpu.MemorySpace.VMEM)] * len(args),
        out_specs=pl.BlockSpec(memory_space=pltpu.MemorySpace.VMEM),
        scratch_shapes=[pltpu.VMEM((T * B_pad, 4 * HIDDEN_SIZE), jnp.float32)],
    )(*args)
    return out[:B]


def fire_spread_lstm_reference_packed(x, p):
    """Pure-JAX reference with the SAME math as the kernel (bf16 operands,
    split layer-1 matmul, gate order i,f,o,g, tanh-form sigmoid) — tight
    correctness check."""
    H = HIDDEN_SIZE
    B, T, D = x.shape
    x2 = jnp.transpose(x, (1, 0, 2)).reshape(T * B, D).astype(jnp.bfloat16)
    zx0_all = jnp.dot(x2, p["wih0_T"], preferred_element_type=jnp.float32) + p["b0"]

    def gates(z):
        s = _sigmoid1(z[:, 0:3 * H])
        g = jnp.tanh(z[:, 3 * H:4 * H])
        return s[:, 0:H], s[:, H:2 * H], s[:, 2 * H:3 * H], g

    h0 = c0 = h1 = c1 = jnp.zeros((B, H), jnp.float32)
    for t in range(T):
        r1 = jnp.dot(h1.astype(jnp.bfloat16), p["w1hh_T"],
                     preferred_element_type=jnp.float32) + p["b1"]
        z0 = (jnp.dot(h0.astype(jnp.bfloat16), p["whh0_T"],
                      preferred_element_type=jnp.float32)
              + zx0_all[t * B:(t + 1) * B, :])
        i0, f0, o0, g0 = gates(z0)
        c0 = f0 * c0 + i0 * g0
        h0 = o0 * jnp.tanh(c0)
        z1 = (jnp.dot(h0.astype(jnp.bfloat16), p["w1ih_T"],
                      preferred_element_type=jnp.float32) + r1)
        i1, f1, o1, g1 = gates(z1)
        c1 = f1 * c1 + i1 * g1
        h1 = o1 * jnp.tanh(c1)
    y = jnp.maximum(h1 @ p["fc1w_T"] + p["fc1b"], 0.0)
    y = jnp.maximum(y @ p["fc2w_T"] + p["fc2b"], 0.0)
    return _sigmoid1(y @ p["fc3w_T"] + p["fc3b"])


def fire_spread_lstm_reference_f32(x, raw):
    """Full-f32 reference with original PyTorch weight layout and gate order
    (i, f, g, o) — guards the gate permutation / weight packing."""
    H = HIDDEN_SIZE
    B, T, _ = x.shape

    def cell(x_t, h, c, w_ih, w_hh, b_ih, b_hh):
        z = x_t @ w_ih.T + h @ w_hh.T + b_ih + b_hh
        i = jax.nn.sigmoid(z[:, 0:H])
        f = jax.nn.sigmoid(z[:, H:2 * H])
        g = jnp.tanh(z[:, 2 * H:3 * H])
        o = jax.nn.sigmoid(z[:, 3 * H:4 * H])
        c = f * c + i * g
        return o * jnp.tanh(c), c

    h0 = c0 = h1 = c1 = jnp.zeros((B, H), jnp.float32)
    for t in range(T):
        h0, c0 = cell(x[:, t, :], h0, c0,
                      raw["w_ih0"], raw["w_hh0"], raw["b_ih0"], raw["b_hh0"])
        h1, c1 = cell(h0, h1, c1,
                      raw["w_ih1"], raw["w_hh1"], raw["b_ih1"], raw["b_hh1"])
    y = jnp.maximum(h1 @ raw["fc1_w"].T + raw["fc1_b"], 0.0)
    y = jnp.maximum(y @ raw["fc2_w"].T + raw["fc2_b"], 0.0)
    return jax.nn.sigmoid(y @ raw["fc3_w"].T + raw["fc3_b"])


if __name__ == "__main__":
    key = jax.random.PRNGKey(0)
    k_param, k_x = jax.random.split(key)

    B, T = 2, 8
    raw = init_raw_params(k_param)
    params = pack_params(raw)
    x = jax.random.normal(k_x, (B, T, INPUT_SIZE), jnp.float32)

    out = jax.block_until_ready(fire_spread_lstm_forward(x, params))
    assert out.shape == (B, OUTPUT_SIZE)

    # Tight check vs. a pure-JAX reference with identical (bf16-operand) math.
    ref_packed = fire_spread_lstm_reference_packed(x, params)
    assert jnp.allclose(out, ref_packed, atol=1e-4, rtol=1e-4), (out, ref_packed)

    # Loose check vs. the full-f32 PyTorch-semantics reference (slack covers
    # bf16 MXU rounding only; catches any gate-permutation / packing bug).
    ref_f32 = fire_spread_lstm_reference_f32(x, raw)
    assert jnp.allclose(out, ref_f32, atol=2e-2, rtol=2e-2), (out, ref_f32)

    print("KERNEL_OK")
</pallas_src>

<mosaic_0001>
module attributes {stable_mosaic.version = 11 : i64} {
  func.func @fire_lstm_kernel(%arg0: memref<64x4xbf16, #tpu.memory_space<vmem>>, %arg1: memref<4x256xbf16, #tpu.memory_space<vmem>>, %arg2: memref<64x256xbf16, #tpu.memory_space<vmem>>, %arg3: memref<1x256xf32, #tpu.memory_space<vmem>>, %arg4: memref<64x256xbf16, #tpu.memory_space<vmem>>, %arg5: memref<64x256xbf16, #tpu.memory_space<vmem>>, %arg6: memref<1x256xf32, #tpu.memory_space<vmem>>, %arg7: memref<64x32xf32, #tpu.memory_space<vmem>>, %arg8: memref<1x32xf32, #tpu.memory_space<vmem>>, %arg9: memref<32x16xf32, #tpu.memory_space<vmem>>, %arg10: memref<1x16xf32, #tpu.memory_space<vmem>>, %arg11: memref<16x1xf32, #tpu.memory_space<vmem>>, %arg12: memref<1x1xf32, #tpu.memory_space<vmem>>, %arg13: memref<8x1xf32, #tpu.memory_space<vmem>>, %arg14: memref<64x256xf32, #tpu.memory_space<vmem>>) attributes {dimension_semantics = [], scalar_prefetch = 0 : i64, scratch_operands = 1 : i64, tpu.core_type = #tpu.core_type<tc>} {
    %c0 = arith.constant 0 : index
    %c0_0 = arith.constant 0 : index
    %0 = vector.load %arg0[%c0, %c0_0] : memref<64x4xbf16, #tpu.memory_space<vmem>>, vector<64x4xbf16>
    %c0_1 = arith.constant 0 : index
    %c0_2 = arith.constant 0 : index
    %1 = vector.load %arg1[%c0_1, %c0_2] : memref<4x256xbf16, #tpu.memory_space<vmem>>, vector<4x256xbf16>
    %cst = arith.constant dense<0.000000e+00> : vector<64x256xf32>
    %2 = tpu.matmul %0, %1, %cst {dimension_numbers = #tpu.dot_dimension_numbers<[1], [0], [0], [1], [0, 0, 1, 1], [], []>} : vector<64x4xbf16>, vector<4x256xbf16>, vector<64x256xf32> -> vector<64x256xf32>
    %c0_3 = arith.constant 0 : index
    %c0_4 = arith.constant 0 : index
    %3 = vector.load %arg3[%c0_3, %c0_4] : memref<1x256xf32, #tpu.memory_space<vmem>>, vector<1x256xf32>
    %4 = vector.broadcast %3 : vector<1x256xf32> to vector<64x256xf32>
    %5 = arith.addf %2, %4 : vector<64x256xf32>
    %c0_5 = arith.constant 0 : index
    %c0_6 = arith.constant 0 : index
    %6 = vector.load %arg14[%c0_5, %c0_6] : memref<64x256xf32, #tpu.memory_space<vmem>>, vector<64x256xf32>
    tpu.vector_store %arg14[%c0_5, %c0_6], %5 {strides = array<i32>} : memref<64x256xf32, #tpu.memory_space<vmem>>, vector<64x256xf32>,
    %cst_7 = arith.constant 0.000000e+00 : f32
    %7 = vector.broadcast %cst_7 : f32 to vector<8x64xf32>
    %cst_8 = arith.constant 0.000000e+00 : f32
    %8 = vector.broadcast %cst_8 : f32 to vector<8x64xf32>
    %cst_9 = arith.constant 0.000000e+00 : f32
    %9 = vector.broadcast %cst_9 : f32 to vector<8x64xf32>
    %cst_10 = arith.constant 0.000000e+00 : f32
    %10 = vector.broadcast %cst_10 : f32 to vector<8x64xf32>
    %11 = arith.truncf %9 : vector<8x64xf32> to vector<8x64xbf16>
    %c0_11 = arith.constant 0 : index
    %c0_12 = arith.constant 0 : index
    %12 = vector.load %arg5[%c0_11, %c0_12] : memref<64x256xbf16, #tpu.memory_space<vmem>>, vector<64x256xbf16>
    %cst_13 = arith.constant dense<0.000000e+00> : vector<8x256xf32>
    %13 = tpu.matmul %11, %12, %cst_13 {dimension_numbers = #tpu.dot_dimension_numbers<[1], [0], [0], [1], [0, 0, 1, 1], [], []>} : vector<8x64xbf16>, vector<64x256xbf16>, vector<8x256xf32> -> vector<8x256xf32>
    %c0_14 = arith.constant 0 : index
    %c0_15 = arith.constant 0 : index
    %14 = vector.load %arg6[%c0_14, %c0_15] : memref<1x256xf32, #tpu.memory_space<vmem>>, vector<1x256xf32>
    %15 = vector.broadcast %14 : vector<1x256xf32> to vector<8x256xf32>
    %16 = arith.addf %13, %15 : vector<8x256xf32>
    %17 = arith.truncf %7 : vector<8x64xf32> to vector<8x64xbf16>
    %c0_16 = arith.constant 0 : index
    %c0_17 = arith.constant 0 : index
    %18 = vector.load %arg2[%c0_16, %c0_17] : memref<64x256xbf16, #tpu.memory_space<vmem>>, vector<64x256xbf16>
    %cst_18 = arith.constant dense<0.000000e+00> : vector<8x256xf32>
    %19 = tpu.matmul %17, %18, %cst_18 {dimension_numbers = #tpu.dot_dimension_numbers<[1], [0], [0], [1], [0, 0, 1, 1], [], []>} : vector<8x64xbf16>, vector<64x256xbf16>, vector<8x256xf32> -> vector<8x256xf32>
    %c0_19 = arith.constant 0 : index
    %c0_20 = arith.constant 0 : index
    %20 = vector.load %arg14[%c0_19, %c0_20] : memref<64x256xf32, #tpu.memory_space<vmem>>, vector<8x256xf32>
    %21 = arith.addf %19, %20 : vector<8x256xf32>
    %22 = vector.extract_strided_slice %21 {offsets = [0, 0], sizes = [8, 192], strides = [1, 1]} : vector<8x256xf32> to vector<8x192xf32>
    %cst_21 = arith.constant 5.000000e-01 : f32
    %23 = vector.broadcast %cst_21 : f32 to vector<8x192xf32>
    %24 = arith.mulf %23, %22 : vector<8x192xf32>
    %25 = math.tanh %24 : vector<8x192xf32>
    %cst_22 = arith.constant 5.000000e-01 : f32
    %26 = vector.broadcast %cst_22 : f32 to vector<8x192xf32>
    %27 = arith.mulf %26, %25 : vector<8x192xf32>
    %cst_23 = arith.constant 5.000000e-01 : f32
    %28 = vector.broadcast %cst_23 : f32 to vector<8x192xf32>
    %29 = arith.addf %27, %28 : vector<8x192xf32>
    %30 = vector.extract_strided_slice %21 {offsets = [0, 192], sizes = [8, 64], strides = [1, 1]} : vector<8x256xf32> to vector<8x64xf32>
    %31 = math.tanh %30 : vector<8x64xf32>
    %32 = vector.extract_strided_slice %29 {offsets = [0, 0], sizes = [8, 64], strides = [1, 1]} : vector<8x192xf32> to vector<8x64xf32>
    %33 = vector.extract_strided_slice %29 {offsets = [0, 64], sizes = [8, 64], strides = [1, 1]} : vector<8x192xf32> to vector<8x64xf32>
    %34 = vector.extract_strided_slice %29 {offsets = [0, 128], sizes = [8, 64], strides = [1, 1]} : vector<8x192xf32> to vector<8x64xf32>
    %35 = arith.mulf %33, %8 : vector<8x64xf32>
    %36 = arith.mulf %32, %31 : vector<8x64xf32>
    %37 = arith.addf %35, %36 : vector<8x64xf32>
    %38 = math.tanh %37 : vector<8x64xf32>
    %39 = arith.mulf %34, %38 : vector<8x64xf32>
    %40 = arith.truncf %39 : vector<8x64xf32> to vector<8x64xbf16>
    %c0_24 = arith.constant 0 : index
    %c0_25 = arith.constant 0 : index
    %41 = vector.load %arg4[%c0_24, %c0_25] : memref<64x256xbf16, #tpu.memory_space<vmem>>, vector<64x256xbf16>
    %cst_26 = arith.constant dense<0.000000e+00> : vector<8x256xf32>
    %42 = tpu.matmul %40, %41, %cst_26 {dimension_numbers = #tpu.dot_dimension_numbers<[1], [0], [0], [1], [0, 0, 1, 1], [], []>} : vector<8x64xbf16>, vector<64x256xbf16>, vector<8x256xf32> -> vector<8x256xf32>
    %43 = arith.addf %42, %16 : vector<8x256xf32>
    %44 = vector.extract_strided_slice %43 {offsets = [0, 0], sizes = [8, 192], strides = [1, 1]} : vector<8x256xf32> to vector<8x192xf32>
    %cst_27 = arith.constant 5.000000e-01 : f32
    %45 = vector.broadcast %cst_27 : f32 to vector<8x192xf32>
    %46 = arith.mulf %45, %44 : vector<8x192xf32>
    %47 = math.tanh %46 : vector<8x192xf32>
    %cst_28 = arith.constant 5.000000e-01 : f32
    %48 = vector.broadcast %cst_28 : f32 to vector<8x192xf32>
    %49 = arith.mulf %48, %47 : vector<8x192xf32>
    %cst_29 = arith.constant 5.000000e-01 : f32
    %50 = vector.broadcast %cst_29 : f32 to vector<8x192xf32>
    %51 = arith.addf %49, %50 : vector<8x192xf32>
    %52 = vector.extract_strided_slice %43 {offsets = [0, 192], sizes = [8, 64], strides = [1, 1]} : vector<8x256xf32> to vector<8x64xf32>
    %53 = math.tanh %52 : vector<8x64xf32>
    %54 = vector.extract_strided_slice %51 {offsets = [0, 0], sizes = [8, 64], strides = [1, 1]} : vector<8x192xf32> to vector<8x64xf32>
    %55 = vector.extract_strided_slice %51 {offsets = [0, 64], sizes = [8, 64], strides = [1, 1]} : vector<8x192xf32> to vector<8x64xf32>
    %56 = vector.extract_strided_slice %51 {offsets = [0, 128], sizes = [8, 64], strides = [1, 1]} : vector<8x192xf32> to vector<8x64xf32>
    %57 = arith.mulf %55, %10 : vector<8x64xf32>
    %58 = arith.mulf %54, %53 : vector<8x64xf32>
    %59 = arith.addf %57, %58 : vector<8x64xf32>
    %60 = math.tanh %59 : vector<8x64xf32>
    %61 = arith.mulf %56, %60 : vector<8x64xf32>
    %62 = arith.truncf %61 : vector<8x64xf32> to vector<8x64xbf16>
    %c0_30 = arith.constant 0 : index
    %c0_31 = arith.constant 0 : index
    %63 = vector.load %arg5[%c0_30, %c0_31] : memref<64x256xbf16, #tpu.memory_space<vmem>>, vector<64x256xbf16>
    %cst_32 = arith.constant dense<0.000000e+00> : vector<8x256xf32>
    %64 = tpu.matmul %62, %63, %cst_32 {dimension_numbers = #tpu.dot_dimension_numbers<[1], [0], [0], [1], [0, 0, 1, 1], [], []>} : vector<8x64xbf16>, vector<64x256xbf16>, vector<8x256xf32> -> vector<8x256xf32>
    %c0_33 = arith.constant 0 : index
    %c0_34 = arith.constant 0 : index
    %65 = vector.load %arg6[%c0_33, %c0_34] : memref<1x256xf32, #tpu.memory_space<vmem>>, vector<1x256xf32>
    %66 = vector.broadcast %65 : vector<1x256xf32> to vector<8x256xf32>
    %67 = arith.addf %64, %66 : vector<8x256xf32>
    %68 = arith.truncf %39 : vector<8x64xf32> to vector<8x64xbf16>
    %c0_35 = arith.constant 0 : index
    %c0_36 = arith.constant 0 : index
    %69 = vector.load %arg2[%c0_35, %c0_36] : memref<64x256xbf16, #tpu.memory_space<vmem>>, vector<64x256xbf16>
    %cst_37 = arith.constant dense<0.000000e+00> : vector<8x256xf32>
    %70 = tpu.matmul %68, %69, %cst_37 {dimension_numbers = #tpu.dot_dimension_numbers<[1], [0], [0], [1], [0, 0, 1, 1], [], []>} : vector<8x64xbf16>, vector<64x256xbf16>, vector<8x256xf32> -> vector<8x256xf32>
    %c8 = arith.constant 8 : index
    %c0_38 = arith.constant 0 : index
    %71 = vector.load %arg14[%c8, %c0_38] : memref<64x256xf32, #tpu.memory_space<vmem>>, vector<8x256xf32>
    %72 = arith.addf %70, %71 : vector<8x256xf32>
    %73 = vector.extract_strided_slice %72 {offsets = [0, 0], sizes = [8, 192], strides = [1, 1]} : vector<8x256xf32> to vector<8x192xf32>
    %cst_39 = arith.constant 5.000000e-01 : f32
    %74 = vector.broadcast %cst_39 : f32 to vector<8x192xf32>
    %75 = arith.mulf %74, %73 : vector<8x192xf32>
    %76 = math.tanh %75 : vector<8x192xf32>
    %cst_40 = arith.constant 5.000000e-01 : f32
    %77 = vector.broadcast %cst_40 : f32 to vector<8x192xf32>
    %78 = arith.mulf %77, %76 : vector<8x192xf32>
    %cst_41 = arith.constant 5.000000e-01 : f32
    %79 = vector.broadcast %cst_41 : f32 to vector<8x192xf32>
    %80 = arith.addf %78, %79 : vector<8x192xf32>
    %81 = vector.extract_strided_slice %72 {offsets = [0, 192], sizes = [8, 64], strides = [1, 1]} : vector<8x256xf32> to vector<8x64xf32>
    %82 = math.tanh %81 : vector<8x64xf32>
    %83 = vector.extract_strided_slice %80 {offsets = [0, 0], sizes = [8, 64], strides = [1, 1]} : vector<8x192xf32> to vector<8x64xf32>
    %84 = vector.extract_strided_slice %80 {offsets = [0, 64], sizes = [8, 64], strides = [1, 1]} : vector<8x192xf32> to vector<8x64xf32>
    %85 = vector.extract_strided_slice %80 {offsets = [0, 128], sizes = [8, 64], strides = [1, 1]} : vector<8x192xf32> to vector<8x64xf32>
    %86 = arith.mulf %84, %37 : vector<8x64xf32>
    %87 = arith.mulf %83, %82 : vector<8x64xf32>
    %88 = arith.addf %86, %87 : vector<8x64xf32>
    %89 = math.tanh %88 : vector<8x64xf32>
    %90 = arith.mulf %85, %89 : vector<8x64xf32>
    %91 = arith.truncf %90 : vector<8x64xf32> to vector<8x64xbf16>
    %c0_42 = arith.constant 0 : index
    %c0_43 = arith.constant 0 : index
    %92 = vector.load %arg4[%c0_42, %c0_43] : memref<64x256xbf16, #tpu.memory_space<vmem>>, vector<64x256xbf16>
    %cst_44 = arith.constant dense<0.000000e+00> : vector<8x256xf32>
    %93 = tpu.matmul %91, %92, %cst_44 {dimension_numbers = #tpu.dot_dimension_numbers<[1], [0], [0], [1], [0, 0, 1, 1], [], []>} : vector<8x64xbf16>, vector<64x256xbf16>, vector<8x256xf32> -> vector<8x256xf32>
    %94 = arith.addf %93, %67 : vector<8x256xf32>
    %95 = vector.extract_strided_slice %94 {offsets = [0, 0], sizes = [8, 192], strides = [1, 1]} : vector<8x256xf32> to vector<8x192xf32>
    %cst_45 = arith.constant 5.000000e-01 : f32
    %96 = vector.broadcast %cst_45 : f32 to vector<8x192xf32>
    %97 = arith.mulf %96, %95 : vector<8x192xf32>
    %98 = math.tanh %97 : vector<8x192xf32>
    %cst_46 = arith.constant 5.000000e-01 : f32
    %99 = vector.broadcast %cst_46 : f32 to vector<8x192xf32>
    %100 = arith.mulf %99, %98 : vector<8x192xf32>
    %cst_47 = arith.constant 5.000000e-01 : f32
    %101 = vector.broadcast %cst_47 : f32 to vector<8x192xf32>
    %102 = arith.addf %100, %101 : vector<8x192xf32>
    %103 = vector.extract_strided_slice %94 {offsets = [0, 192], sizes = [8, 64], strides = [1, 1]} : vector<8x256xf32> to vector<8x64xf32>
    %104 = math.tanh %103 : vector<8x64xf32>
    %105 = vector.extract_strided_slice %102 {offsets = [0, 0], sizes = [8, 64], strides = [1, 1]} : vector<8x192xf32> to vector<8x64xf32>
    %106 = vector.extract_strided_slice %102 {offsets = [0, 64], sizes = [8, 64], strides = [1, 1]} : vector<8x192xf32> to vector<8x64xf32>
    %107 = vector.extract_strided_slice %102 {offsets = [0, 128], sizes = [8, 64], strides = [1, 1]} : vector<8x192xf32> to vector<8x64xf32>
    %108 = arith.mulf %106, %59 : vector<8x64xf32>
    %109 = arith.mulf %105, %104 : vector<8x64xf32>
    %110 = arith.addf %108, %109 : vector<8x64xf32>
    %111 = math.tanh %110 : vector<8x64xf32>
    %112 = arith.mulf %107, %111 : vector<8x64xf32>
    %113 = arith.truncf %112 : vector<8x64xf32> to vector<8x64xbf16>
    %c0_48 = arith.constant 0 : index
    %c0_49 = arith.constant 0 : index
    %114 = vector.load %arg5[%c0_48, %c0_49] : memref<64x256xbf16, #tpu.memory_space<vmem>>, vector<64x256xbf16>
    %cst_50 = arith.constant dense<0.000000e+00> : vector<8x256xf32>
    %115 = tpu.matmul %113, %114, %cst_50 {dimension_numbers = #tpu.dot_dimension_numbers<[1], [0], [0], [1], [0, 0, 1, 1], [], []>} : vector<8x64xbf16>, vector<64x256xbf16>, vector<8x256xf32> -> vector<8x256xf32>
    %c0_51 = arith.constant 0 : index
    %c0_52 = arith.constant 0 : index
    %116 = vector.load %arg6[%c0_51, %c0_52] : memref<1x256xf32, #tpu.memory_space<vmem>>, vector<1x256xf32>
    %117 = vector.broadcast %116 : vector<1x256xf32> to vector<8x256xf32>
    %118 = arith.addf %115, %117 : vector<8x256xf32>
    %119 = arith.truncf %90 : vector<8x64xf32> to vector<8x64xbf16>
    %c0_53 = arith.constant 0 : index
    %c0_54 = arith.constant 0 : index
    %120 = vector.load %arg2[%c0_53, %c0_54] : memref<64x256xbf16, #tpu.memory_space<vmem>>, vector<64x256xbf16>
    %cst_55 = arith.constant dense<0.000000e+00> : vector<8x256xf32>
    %121 = tpu.matmul %119, %120, %cst_55 {dimension_numbers = #tpu.dot_dimension_numbers<[1], [0], [0], [1], [0, 0, 1, 1], [], []>} : vector<8x64xbf16>, vector<64x256xbf16>, vector<8x256xf32> -> vector<8x256xf32>
    %c16 = arith.constant 16 : index
    %c0_56 = arith.constant 0 : index
    %122 = vector.load %arg14[%c16, %c0_56] : memref<64x256xf32, #tpu.memory_space<vmem>>, vector<8x256xf32>
    %123 = arith.addf %121, %122 : vector<8x256xf32>
    %124 = vector.extract_strided_slice %123 {offsets = [0, 0], sizes = [8, 192], strides = [1, 1]} : vector<8x256xf32> to vector<8x192xf32>
    %cst_57 = arith.constant 5.000000e-01 : f32
    %125 = vector.broadcast %cst_57 : f32 to vector<8x192xf32>
    %126 = arith.mulf %125, %124 : vector<8x192xf32>
    %127 = math.tanh %126 : vector<8x192xf32>
    %cst_58 = arith.constant 5.000000e-01 : f32
    %128 = vector.broadcast %cst_58 : f32 to vector<8x192xf32>
    %129 = arith.mulf %128, %127 : vector<8x192xf32>
    %cst_59 = arith.constant 5.000000e-01 : f32
    %130 = vector.broadcast %cst_59 : f32 to vector<8x192xf32>
    %131 = arith.addf %129, %130 : vector<8x192xf32>
    %132 = vector.extract_strided_slice %123 {offsets = [0, 192], sizes = [8, 64], strides = [1, 1]} : vector<8x256xf32> to vector<8x64xf32>
    %133 = math.tanh %132 : vector<8x64xf32>
    %134 = vector.extract_strided_slice %131 {offsets = [0, 0], sizes = [8, 64], strides = [1, 1]} : vector<8x192xf32> to vector<8x64xf32>
    %135 = vector.extract_strided_slice %131 {offsets = [0, 64], sizes = [8, 64], strides = [1, 1]} : vector<8x192xf32> to vector<8x64xf32>
    %136 = vector.extract_strided_slice %131 {offsets = [0, 128], sizes = [8, 64], strides = [1, 1]} : vector<8x192xf32> to vector<8x64xf32>
    %137 = arith.mulf %135, %88 : vector<8x64xf32>
    %138 = arith.mulf %134, %133 : vector<8x64xf32>
    %139 = arith.addf %137, %138 : vector<8x64xf32>
    %140 = math.tanh %139 : vector<8x64xf32>
    %141 = arith.mulf %136, %140 : vector<8x64xf32>
    %142 = arith.truncf %141 : vector<8x64xf32> to vector<8x64xbf16>
    %c0_60 = arith.constant 0 : index
    %c0_61 = arith.constant 0 : index
    %143 = vector.load %arg4[%c0_60, %c0_61] : memref<64x256xbf16, #tpu.memory_space<vmem>>, vector<64x256xbf16>
    %cst_62 = arith.constant dense<0.000000e+00> : vector<8x256xf32>
    %144 = tpu.matmul %142, %143, %cst_62 {dimension_numbers = #tpu.dot_dimension_numbers<[1], [0], [0], [1], [0, 0, 1, 1], [], []>} : vector<8x64xbf16>, vector<64x256xbf16>, vector<8x256xf32> -> vector<8x256xf32>
    %145 = arith.addf %144, %118 : vector<8x256xf32>
    %146 = vector.extract_strided_slice %145 {offsets = [0, 0], sizes = [8, 192], strides = [1, 1]} : vector<8x256xf32> to vector<8x192xf32>
    %cst_63 = arith.constant 5.000000e-01 : f32
    %147 = vector.broadcast %cst_63 : f32 to vector<8x192xf32>
    %148 = arith.mulf %147, %146 : vector<8x192xf32>
    %149 = math.tanh %148 : vector<8x192xf32>
    %cst_64 = arith.constant 5.000000e-01 : f32
    %150 = vector.broadcast %cst_64 : f32 to vector<8x192xf32>
    %151 = arith.mulf %150, %149 : vector<8x192xf32>
    %cst_65 = arith.constant 5.000000e-01 : f32
    %152 = vector.broadcast %cst_65 : f32 to vector<8x192xf32>
    %153 = arith.addf %151, %152 : vector<8x192xf32>
    %154 = vector.extract_strided_slice %145 {offsets = [0, 192], sizes = [8, 64], strides = [1, 1]} : vector<8x256xf32> to vector<8x64xf32>
    %155 = math.tanh %154 : vector<8x64xf32>
    %156 = vector.extract_strided_slice %153 {offsets = [0, 0], sizes = [8, 64], strides = [1, 1]} : vector<8x192xf32> to vector<8x64xf32>
    %157 = vector.extract_strided_slice %153 {offsets = [0, 64], sizes = [8, 64], strides = [1, 1]} : vector<8x192xf32> to vector<8x64xf32>
    %158 = vector.extract_strided_slice %153 {offsets = [0, 128], sizes = [8, 64], strides = [1, 1]} : vector<8x192xf32> to vector<8x64xf32>
    %159 = arith.mulf %157, %110 : vector<8x64xf32>
    %160 = arith.mulf %156, %155 : vector<8x64xf32>
    %161 = arith.addf %159, %160 : vector<8x64xf32>
    %162 = math.tanh %161 : vector<8x64xf32>
    %163 = arith.mulf %158, %162 : vector<8x64xf32>
    %164 = arith.truncf %163 : vector<8x64xf32> to vector<8x64xbf16>
    %c0_66 = arith.constant 0 : index
    %c0_67 = arith.constant 0 : index
    %165 = vector.load %arg5[%c0_66, %c0_67] : memref<64x256xbf16, #tpu.memory_space<vmem>>, vector<64x256xbf16>
    %cst_68 = arith.constant dense<0.000000e+00> : vector<8x256xf32>
    %166 = tpu.matmul %164, %165, %cst_68 {dimension_numbers = #tpu.dot_dimension_numbers<[1], [0], [0], [1], [0, 0, 1, 1], [], []>} : vector<8x64xbf16>, vector<64x256xbf16>, vector<8x256xf32> -> vector<8x256xf32>
    %c0_69 = arith.constant 0 : index
    %c0_70 = arith.constant 0 : index
    %167 = vector.load %arg6[%c0_69, %c0_70] : memref<1x256xf32, #tpu.memory_space<vmem>>, vector<1x256xf32>
    %168 = vector.broadcast %167 : vector<1x256xf32> to vector<8x256xf32>
    %169 = arith.addf %166, %168 : vector<8x256xf32>
    %170 = arith.truncf %141 : vector<8x64xf32> to vector<8x64xbf16>
    %c0_71 = arith.constant 0 : index
    %c0_72 = arith.constant 0 : index
    %171 = vector.load %arg2[%c0_71, %c0_72] : memref<64x256xbf16, #tpu.memory_space<vmem>>, vector<64x256xbf16>
    %cst_73 = arith.constant dense<0.000000e+00> : vector<8x256xf32>
    %172 = tpu.matmul %170, %171, %cst_73 {dimension_numbers = #tpu.dot_dimension_numbers<[1], [0], [0], [1], [0, 0, 1, 1], [], []>} : vector<8x64xbf16>, vector<64x256xbf16>, vector<8x256xf32> -> vector<8x256xf32>
    %c24 = arith.constant 24 : index
    %c0_74 = arith.constant 0 : index
    %173 = vector.load %arg14[%c24, %c0_74] : memref<64x256xf32, #tpu.memory_space<vmem>>, vector<8x256xf32>
    %174 = arith.addf %172, %173 : vector<8x256xf32>
    %175 = vector.extract_strided_slice %174 {offsets = [0, 0], sizes = [8, 192], strides = [1, 1]} : vector<8x256xf32> to vector<8x192xf32>
    %cst_75 = arith.constant 5.000000e-01 : f32
    %176 = vector.broadcast %cst_75 : f32 to vector<8x192xf32>
    %177 = arith.mulf %176, %175 : vector<8x192xf32>
    %178 = math.tanh %177 : vector<8x192xf32>
    %cst_76 = arith.constant 5.000000e-01 : f32
    %179 = vector.broadcast %cst_76 : f32 to vector<8x192xf32>
    %180 = arith.mulf %179, %178 : vector<8x192xf32>
    %cst_77 = arith.constant 5.000000e-01 : f32
    %181 = vector.broadcast %cst_77 : f32 to vector<8x192xf32>
    %182 = arith.addf %180, %181 : vector<8x192xf32>
    %183 = vector.extract_strided_slice %174 {offsets = [0, 192], sizes = [8, 64], strides = [1, 1]} : vector<8x256xf32> to vector<8x64xf32>
    %184 = math.tanh %183 : vector<8x64xf32>
    %185 = vector.extract_strided_slice %182 {offsets = [0, 0], sizes = [8, 64], strides = [1, 1]} : vector<8x192xf32> to vector<8x64xf32>
    %186 = vector.extract_strided_slice %182 {offsets = [0, 64], sizes = [8, 64], strides = [1, 1]} : vector<8x192xf32> to vector<8x64xf32>
    %187 = vector.extract_strided_slice %182 {offsets = [0, 128], sizes = [8, 64], strides = [1, 1]} : vector<8x192xf32> to vector<8x64xf32>
    %188 = arith.mulf %186, %139 : vector<8x64xf32>
    %189 = arith.mulf %185, %184 : vector<8x64xf32>
    %190 = arith.addf %188, %189 : vector<8x64xf32>
    %191 = math.tanh %190 : vector<8x64xf32>
    %192 = arith.mulf %187, %191 : vector<8x64xf32>
    %193 = arith.truncf %192 : vector<8x64xf32> to vector<8x64xbf16>
    %c0_78 = arith.constant 0 : index
    %c0_79 = arith.constant 0 : index
    %194 = vector.load %arg4[%c0_78, %c0_79] : memref<64x256xbf16, #tpu.memory_space<vmem>>, vector<64x256xbf16>
    %cst_80 = arith.constant dense<0.000000e+00> : vector<8x256xf32>
    %195 = tpu.matmul %193, %194, %cst_80 {dimension_numbers = #tpu.dot_dimension_numbers<[1], [0], [0], [1], [0, 0, 1, 1], [], []>} : vector<8x64xbf16>, vector<64x256xbf16>, vector<8x256xf32> -> vector<8x256xf32>
    %196 = arith.addf %195, %169 : vector<8x256xf32>
    %197 = vector.extract_strided_slice %196 {offsets = [0, 0], sizes = [8, 192], strides = [1, 1]} : vector<8x256xf32> to vector<8x192xf32>
    %cst_81 = arith.constant 5.000000e-01 : f32
    %198 = vector.broadcast %cst_81 : f32 to vector<8x192xf32>
    %199 = arith.mulf %198, %197 : vector<8x192xf32>
    %200 = math.tanh %199 : vector<8x192xf32>
    %cst_82 = arith.constant 5.000000e-01 : f32
    %201 = vector.broadcast %cst_82 : f32 to vector<8x192xf32>
    %202 = arith.mulf %201, %200 : vector<8x192xf32>
    %cst_83 = arith.constant 5.000000e-01 : f32
    %203 = vector.broadcast %cst_83 : f32 to vector<8x192xf32>
    %204 = arith.addf %202, %203 : vector<8x192xf32>
    %205 = vector.extract_strided_slice %196 {offsets = [0, 192], sizes = [8, 64], strides = [1, 1]} : vector<8x256xf32> to vector<8x64xf32>
    %206 = math.tanh %205 : vector<8x64xf32>
    %207 = vector.extract_strided_slice %204 {offsets = [0, 0], sizes = [8, 64], strides = [1, 1]} : vector<8x192xf32> to vector<8x64xf32>
    %208 = vector.extract_strided_slice %204 {offsets = [0, 64], sizes = [8, 64], strides = [1, 1]} : vector<8x192xf32> to vector<8x64xf32>
    %209 = vector.extract_strided_slice %204 {offsets = [0, 128], sizes = [8, 64], strides = [1, 1]} : vector<8x192xf32> to vector<8x64xf32>
    %210 = arith.mulf %208, %161 : vector<8x64xf32>
    %211 = arith.mulf %207, %206 : vector<8x64xf32>
    %212 = arith.addf %210, %211 : vector<8x64xf32>
    %213 = math.tanh %212 : vector<8x64xf32>
    %214 = arith.mulf %209, %213 : vector<8x64xf32>
    %215 = arith.truncf %214 : vector<8x64xf32> to vector<8x64xbf16>
    %c0_84 = arith.constant 0 : index
    %c0_85 = arith.constant 0 : index
    %216 = vector.load %arg5[%c0_84, %c0_85] : memref<64x256xbf16, #tpu.memory_space<vmem>>, vector<64x256xbf16>
    %cst_86 = arith.constant dense<0.000000e+00> : vector<8x256xf32>
    %217 = tpu.matmul %215, %216, %cst_86 {dimension_numbers = #tpu.dot_dimension_numbers<[1], [0], [0], [1], [0, 0, 1, 1], [], []>} : vector<8x64xbf16>, vector<64x256xbf16>, vector<8x256xf32> -> vector<8x256xf32>
    %c0_87 = arith.constant 0 : index
    %c0_88 = arith.constant 0 : index
    %218 = vector.load %arg6[%c0_87, %c0_88] : memref<1x256xf32, #tpu.memory_space<vmem>>, vector<1x256xf32>
    %219 = vector.broadcast %218 : vector<1x256xf32> to vector<8x256xf32>
    %220 = arith.addf %217, %219 : vector<8x256xf32>
    %221 = arith.truncf %192 : vector<8x64xf32> to vector<8x64xbf16>
    %c0_89 = arith.constant 0 : index
    %c0_90 = arith.constant 0 : index
    %222 = vector.load %arg2[%c0_89, %c0_90] : memref<64x256xbf16, #tpu.memory_space<vmem>>, vector<64x256xbf16>
    %cst_91 = arith.constant dense<0.000000e+00> : vector<8x256xf32>
    %223 = tpu.matmul %221, %222, %cst_91 {dimension_numbers = #tpu.dot_dimension_numbers<[1], [0], [0], [1], [0, 0, 1, 1], [], []>} : vector<8x64xbf16>, vector<64x256xbf16>, vector<8x256xf32> -> vector<8x256xf32>
    %c32 = arith.constant 32 : index
    %c0_92 = arith.constant 0 : index
    %224 = vector.load %arg14[%c32, %c0_92] : memref<64x256xf32, #tpu.memory_space<vmem>>, vector<8x256xf32>
    %225 = arith.addf %223, %224 : vector<8x256xf32>
    %226 = vector.extract_strided_slice %225 {offsets = [0, 0], sizes = [8, 192], strides = [1, 1]} : vector<8x256xf32> to vector<8x192xf32>
    %cst_93 = arith.constant 5.000000e-01 : f32
    %227 = vector.broadcast %cst_93 : f32 to vector<8x192xf32>
    %228 = arith.mulf %227, %226 : vector<8x192xf32>
    %229 = math.tanh %228 : vector<8x192xf32>
    %cst_94 = arith.constant 5.000000e-01 : f32
    %230 = vector.broadcast %cst_94 : f32 to vector<8x192xf32>
    %231 = arith.mulf %230, %229 : vector<8x192xf32>
    %cst_95 = arith.constant 5.000000e-01 : f32
    %232 = vector.broadcast %cst_95 : f32 to vector<8x192xf32>
    %233 = arith.addf %231, %232 : vector<8x192xf32>
    %234 = vector.extract_strided_slice %225 {offsets = [0, 192], sizes = [8, 64], strides = [1, 1]} : vector<8x256xf32> to vector<8x64xf32>
    %235 = math.tanh %234 : vector<8x64xf32>
    %236 = vector.extract_strided_slice %233 {offsets = [0, 0], sizes = [8, 64], strides = [1, 1]} : vector<8x192xf32> to vector<8x64xf32>
    %237 = vector.extract_strided_slice %233 {offsets = [0, 64], sizes = [8, 64], strides = [1, 1]} : vector<8x192xf32> to vector<8x64xf32>
    %238 = vector.extract_strided_slice %233 {offsets = [0, 128], sizes = [8, 64], strides = [1, 1]} : vector<8x192xf32> to vector<8x64xf32>
    %239 = arith.mulf %237, %190 : vector<8x64xf32>
    %240 = arith.mulf %236, %235 : vector<8x64xf32>
    %241 = arith.addf %239, %240 : vector<8x64xf32>
    %242 = math.tanh %241 : vector<8x64xf32>
    %243 = arith.mulf %238, %242 : vector<8x64xf32>
    %244 = arith.truncf %243 : vector<8x64xf32> to vector<8x64xbf16>
    %c0_96 = arith.constant 0 : index
    %c0_97 = arith.constant 0 : index
    %245 = vector.load %arg4[%c0_96, %c0_97] : memref<64x256xbf16, #tpu.memory_space<vmem>>, vector<64x256xbf16>
    %cst_98 = arith.constant dense<0.000000e+00> : vector<8x256xf32>
    %246 = tpu.matmul %244, %245, %cst_98 {dimension_numbers = #tpu.dot_dimension_numbers<[1], [0], [0], [1], [0, 0, 1, 1], [], []>} : vector<8x64xbf16>, vector<64x256xbf16>, vector<8x256xf32> -> vector<8x256xf32>
    %247 = arith.addf %246, %220 : vector<8x256xf32>
    %248 = vector.extract_strided_slice %247 {offsets = [0, 0], sizes = [8, 192], strides = [1, 1]} : vector<8x256xf32> to vector<8x192xf32>
    %cst_99 = arith.constant 5.000000e-01 : f32
    %249 = vector.broadcast %cst_99 : f32 to vector<8x192xf32>
    %250 = arith.mulf %249, %248 : vector<8x192xf32>
    %251 = math.tanh %250 : vector<8x192xf32>
    %cst_100 = arith.constant 5.000000e-01 : f32
    %252 = vector.broadcast %cst_100 : f32 to vector<8x192xf32>
    %253 = arith.mulf %252, %251 : vector<8x192xf32>
    %cst_101 = arith.constant 5.000000e-01 : f32
    %254 = vector.broadcast %cst_101 : f32 to vector<8x192xf32>
    %255 = arith.addf %253, %254 : vector<8x192xf32>
    %256 = vector.extract_strided_slice %247 {offsets = [0, 192], sizes = [8, 64], strides = [1, 1]} : vector<8x256xf32> to vector<8x64xf32>
    %257 = math.tanh %256 : vector<8x64xf32>
    %258 = vector.extract_strided_slice %255 {offsets = [0, 0], sizes = [8, 64], strides = [1, 1]} : vector<8x192xf32> to vector<8x64xf32>
    %259 = vector.extract_strided_slice %255 {offsets = [0, 64], sizes = [8, 64], strides = [1, 1]} : vector<8x192xf32> to vector<8x64xf32>
    %260 = vector.extract_strided_slice %255 {offsets = [0, 128], sizes = [8, 64], strides = [1, 1]} : vector<8x192xf32> to vector<8x64xf32>
    %261 = arith.mulf %259, %212 : vector<8x64xf32>
    %262 = arith.mulf %258, %257 : vector<8x64xf32>
    %263 = arith.addf %261, %262 : vector<8x64xf32>
    %264 = math.tanh %263 : vector<8x64xf32>
    %265 = arith.mulf %260, %264 : vector<8x64xf32>
    %266 = arith.truncf %265 : vector<8x64xf32> to vector<8x64xbf16>
    %c0_102 = arith.constant 0 : index
    %c0_103 = arith.constant 0 : index
    %267 = vector.load %arg5[%c0_102, %c0_103] : memref<64x256xbf16, #tpu.memory_space<vmem>>, vector<64x256xbf16>
    %cst_104 = arith.constant dense<0.000000e+00> : vector<8x256xf32>
    %268 = tpu.matmul %266, %267, %cst_104 {dimension_numbers = #tpu.dot_dimension_numbers<[1], [0], [0], [1], [0, 0, 1, 1], [], []>} : vector<8x64xbf16>, vector<64x256xbf16>, vector<8x256xf32> -> vector<8x256xf32>
    %c0_105 = arith.constant 0 : index
    %c0_106 = arith.constant 0 : index
    %269 = vector.load %arg6[%c0_105, %c0_106] : memref<1x256xf32, #tpu.memory_space<vmem>>, vector<1x256xf32>
    %270 = vector.broadcast %269 : vector<1x256xf32> to vector<8x256xf32>
    %271 = arith.addf %268, %270 : vector<8x256xf32>
    %272 = arith.truncf %243 : vector<8x64xf32> to vector<8x64xbf16>
    %c0_107 = arith.constant 0 : index
    %c0_108 = arith.constant 0 : index
    %273 = vector.load %arg2[%c0_107, %c0_108] : memref<64x256xbf16, #tpu.memory_space<vmem>>, vector<64x256xbf16>
    %cst_109 = arith.constant dense<0.000000e+00> : vector<8x256xf32>
    %274 = tpu.matmul %272, %273, %cst_109 {dimension_numbers = #tpu.dot_dimension_numbers<[1], [0], [0], [1], [0, 0, 1, 1], [], []>} : vector<8x64xbf16>, vector<64x256xbf16>, vector<8x256xf32> -> vector<8x256xf32>
    %c40 = arith.constant 40 : index
    %c0_110 = arith.constant 0 : index
    %275 = vector.load %arg14[%c40, %c0_110] : memref<64x256xf32, #tpu.memory_space<vmem>>, vector<8x256xf32>
    %276 = arith.addf %274, %275 : vector<8x256xf32>
    %277 = vector.extract_strided_slice %276 {offsets = [0, 0], sizes = [8, 192], strides = [1, 1]} : vector<8x256xf32> to vector<8x192xf32>
    %cst_111 = arith.constant 5.000000e-01 : f32
    %278 = vector.broadcast %cst_111 : f32 to vector<8x192xf32>
    %279 = arith.mulf %278, %277 : vector<8x192xf32>
    %280 = math.tanh %279 : vector<8x192xf32>
    %cst_112 = arith.constant 5.000000e-01 : f32
    %281 = vector.broadcast %cst_112 : f32 to vector<8x192xf32>
    %282 = arith.mulf %281, %280 : vector<8x192xf32>
    %cst_113 = arith.constant 5.000000e-01 : f32
    %283 = vector.broadcast %cst_113 : f32 to vector<8x192xf32>
    %284 = arith.addf %282, %283 : vector<8x192xf32>
    %285 = vector.extract_strided_slice %276 {offsets = [0, 192], sizes = [8, 64], strides = [1, 1]} : vector<8x256xf32> to vector<8x64xf32>
    %286 = math.tanh %285 : vector<8x64xf32>
    %287 = vector.extract_strided_slice %284 {offsets = [0, 0], sizes = [8, 64], strides = [1, 1]} : vector<8x192xf32> to vector<8x64xf32>
    %288 = vector.extract_strided_slice %284 {offsets = [0, 64], sizes = [8, 64], strides = [1, 1]} : vector<8x192xf32> to vector<8x64xf32>
    %289 = vector.extract_strided_slice %284 {offsets = [0, 128], sizes = [8, 64], strides = [1, 1]} : vector<8x192xf32> to vector<8x64xf32>
    %290 = arith.mulf %288, %241 : vector<8x64xf32>
    %291 = arith.mulf %287, %286 : vector<8x64xf32>
    %292 = arith.addf %290, %291 : vector<8x64xf32>
    %293 = math.tanh %292 : vector<8x64xf32>
    %294 = arith.mulf %289, %293 : vector<8x64xf32>
    %295 = arith.truncf %294 : vector<8x64xf32> to vector<8x64xbf16>
    %c0_114 = arith.constant 0 : index
    %c0_115 = arith.constant 0 : index
    %296 = vector.load %arg4[%c0_114, %c0_115] : memref<64x256xbf16, #tpu.memory_space<vmem>>, vector<64x256xbf16>
    %cst_116 = arith.constant dense<0.000000e+00> : vector<8x256xf32>
    %297 = tpu.matmul %295, %296, %cst_116 {dimension_numbers = #tpu.dot_dimension_numbers<[1], [0], [0], [1], [0, 0, 1, 1], [], []>} : vector<8x64xbf16>, vector<64x256xbf16>, vector<8x256xf32> -> vector<8x256xf32>
    %298 = arith.addf %297, %271 : vector<8x256xf32>
    %299 = vector.extract_strided_slice %298 {offsets = [0, 0], sizes = [8, 192], strides = [1, 1]} : vector<8x256xf32> to vector<8x192xf32>
    %cst_117 = arith.constant 5.000000e-01 : f32
    %300 = vector.broadcast %cst_117 : f32 to vector<8x192xf32>
    %301 = arith.mulf %300, %299 : vector<8x192xf32>
    %302 = math.tanh %301 : vector<8x192xf32>
    %cst_118 = arith.constant 5.000000e-01 : f32
    %303 = vector.broadcast %cst_118 : f32 to vector<8x192xf32>
    %304 = arith.mulf %303, %302 : vector<8x192xf32>
    %cst_119 = arith.constant 5.000000e-01 : f32
    %305 = vector.broadcast %cst_119 : f32 to vector<8x192xf32>
    %306 = arith.addf %304, %305 : vector<8x192xf32>
    %307 = vector.extract_strided_slice %298 {offsets = [0, 192], sizes = [8, 64], strides = [1, 1]} : vector<8x256xf32> to vector<8x64xf32>
    %308 = math.tanh %307 : vector<8x64xf32>
    %309 = vector.extract_strided_slice %306 {offsets = [0, 0], sizes = [8, 64], strides = [1, 1]} : vector<8x192xf32> to vector<8x64xf32>
    %310 = vector.extract_strided_slice %306 {offsets = [0, 64], sizes = [8, 64], strides = [1, 1]} : vector<8x192xf32> to vector<8x64xf32>
    %311 = vector.extract_strided_slice %306 {offsets = [0, 128], sizes = [8, 64], strides = [1, 1]} : vector<8x192xf32> to vector<8x64xf32>
    %312 = arith.mulf %310, %263 : vector<8x64xf32>
    %313 = arith.mulf %309, %308 : vector<8x64xf32>
    %314 = arith.addf %312, %313 : vector<8x64xf32>
    %315 = math.tanh %314 : vector<8x64xf32>
    %316 = arith.mulf %311, %315 : vector<8x64xf32>
    %317 = arith.truncf %316 : vector<8x64xf32> to vector<8x64xbf16>
    %c0_120 = arith.constant 0 : index
    %c0_121 = arith.constant 0 : index
    %318 = vector.load %arg5[%c0_120, %c0_121] : memref<64x256xbf16, #tpu.memory_space<vmem>>, vector<64x256xbf16>
    %cst_122 = arith.constant dense<0.000000e+00> : vector<8x256xf32>
    %319 = tpu.matmul %317, %318, %cst_122 {dimension_numbers = #tpu.dot_dimension_numbers<[1], [0], [0], [1], [0, 0, 1, 1], [], []>} : vector<8x64xbf16>, vector<64x256xbf16>, vector<8x256xf32> -> vector<8x256xf32>
    %c0_123 = arith.constant 0 : index
    %c0_124 = arith.constant 0 : index
    %320 = vector.load %arg6[%c0_123, %c0_124] : memref<1x256xf32, #tpu.memory_space<vmem>>, vector<1x256xf32>
    %321 = vector.broadcast %320 : vector<1x256xf32> to vector<8x256xf32>
    %322 = arith.addf %319, %321 : vector<8x256xf32>
    %323 = arith.truncf %294 : vector<8x64xf32> to vector<8x64xbf16>
    %c0_125 = arith.constant 0 : index
    %c0_126 = arith.constant 0 : index
    %324 = vector.load %arg2[%c0_125, %c0_126] : memref<64x256xbf16, #tpu.memory_space<vmem>>, vector<64x256xbf16>
    %cst_127 = arith.constant dense<0.000000e+00> : vector<8x256xf32>
    %325 = tpu.matmul %323, %324, %cst_127 {dimension_numbers = #tpu.dot_dimension_numbers<[1], [0], [0], [1], [0, 0, 1, 1], [], []>} : vector<8x64xbf16>, vector<64x256xbf16>, vector<8x256xf32> -> vector<8x256xf32>
    %c48 = arith.constant 48 : index
    %c0_128 = arith.constant 0 : index
    %326 = vector.load %arg14[%c48, %c0_128] : memref<64x256xf32, #tpu.memory_space<vmem>>, vector<8x256xf32>
    %327 = arith.addf %325, %326 : vector<8x256xf32>
    %328 = vector.extract_strided_slice %327 {offsets = [0, 0], sizes = [8, 192], strides = [1, 1]} : vector<8x256xf32> to vector<8x192xf32>
    %cst_129 = arith.constant 5.000000e-01 : f32
    %329 = vector.broadcast %cst_129 : f32 to vector<8x192xf32>
    %330 = arith.mulf %329, %328 : vector<8x192xf32>
    %331 = math.tanh %330 : vector<8x192xf32>
    %cst_130 = arith.constant 5.000000e-01 : f32
    %332 = vector.broadcast %cst_130 : f32 to vector<8x192xf32>
    %333 = arith.mulf %332, %331 : vector<8x192xf32>
    %cst_131 = arith.constant 5.000000e-01 : f32
    %334 = vector.broadcast %cst_131 : f32 to vector<8x192xf32>
    %335 = arith.addf %333, %334 : vector<8x192xf32>
    %336 = vector.extract_strided_slice %327 {offsets = [0, 192], sizes = [8, 64], strides = [1, 1]} : vector<8x256xf32> to vector<8x64xf32>
    %337 = math.tanh %336 : vector<8x64xf32>
    %338 = vector.extract_strided_slice %335 {offsets = [0, 0], sizes = [8, 64], strides = [1, 1]} : vector<8x192xf32> to vector<8x64xf32>
    %339 = vector.extract_strided_slice %335 {offsets = [0, 64], sizes = [8, 64], strides = [1, 1]} : vector<8x192xf32> to vector<8x64xf32>
    %340 = vector.extract_strided_slice %335 {offsets = [0, 128], sizes = [8, 64], strides = [1, 1]} : vector<8x192xf32> to vector<8x64xf32>
    %341 = arith.mulf %339, %292 : vector<8x64xf32>
    %342 = arith.mulf %338, %337 : vector<8x64xf32>
    %343 = arith.addf %341, %342 : vector<8x64xf32>
    %344 = math.tanh %343 : vector<8x64xf32>
    %345 = arith.mulf %340, %344 : vector<8x64xf32>
    %346 = arith.truncf %345 : vector<8x64xf32> to vector<8x64xbf16>
    %c0_132 = arith.constant 0 : index
    %c0_133 = arith.constant 0 : index
    %347 = vector.load %arg4[%c0_132, %c0_133] : memref<64x256xbf16, #tpu.memory_space<vmem>>, vector<64x256xbf16>
    %cst_134 = arith.constant dense<0.000000e+00> : vector<8x256xf32>
    %348 = tpu.matmul %346, %347, %cst_134 {dimension_numbers = #tpu.dot_dimension_numbers<[1], [0], [0], [1], [0, 0, 1, 1], [], []>} : vector<8x64xbf16>, vector<64x256xbf16>, vector<8x256xf32> -> vector<8x256xf32>
    %349 = arith.addf %348, %322 : vector<8x256xf32>
    %350 = vector.extract_strided_slice %349 {offsets = [0, 0], sizes = [8, 192], strides = [1, 1]} : vector<8x256xf32> to vector<8x192xf32>
    %cst_135 = arith.constant 5.000000e-01 : f32
    %351 = vector.broadcast %cst_135 : f32 to vector<8x192xf32>
    %352 = arith.mulf %351, %350 : vector<8x192xf32>
    %353 = math.tanh %352 : vector<8x192xf32>
    %cst_136 = arith.constant 5.000000e-01 : f32
    %354 = vector.broadcast %cst_136 : f32 to vector<8x192xf32>
    %355 = arith.mulf %354, %353 : vector<8x192xf32>
    %cst_137 = arith.constant 5.000000e-01 : f32
    %356 = vector.broadcast %cst_137 : f32 to vector<8x192xf32>
    %357 = arith.addf %355, %356 : vector<8x192xf32>
    %358 = vector.extract_strided_slice %349 {offsets = [0, 192], sizes = [8, 64], strides = [1, 1]} : vector<8x256xf32> to vector<8x64xf32>
    %359 = math.tanh %358 : vector<8x64xf32>
    %360 = vector.extract_strided_slice %357 {offsets = [0, 0], sizes = [8, 64], strides = [1, 1]} : vector<8x192xf32> to vector<8x64xf32>
    %361 = vector.extract_strided_slice %357 {offsets = [0, 64], sizes = [8, 64], strides = [1, 1]} : vector<8x192xf32> to vector<8x64xf32>
    %362 = vector.extract_strided_slice %357 {offsets = [0, 128], sizes = [8, 64], strides = [1, 1]} : vector<8x192xf32> to vector<8x64xf32>
    %363 = arith.mulf %361, %314 : vector<8x64xf32>
    %364 = arith.mulf %360, %359 : vector<8x64xf32>
    %365 = arith.addf %363, %364 : vector<8x64xf32>
    %366 = math.tanh %365 : vector<8x64xf32>
    %367 = arith.mulf %362, %366 : vector<8x64xf32>
    %368 = arith.truncf %367 : vector<8x64xf32> to vector<8x64xbf16>
    %c0_138 = arith.constant 0 : index
    %c0_139 = arith.constant 0 : index
    %369 = vector.load %arg5[%c0_138, %c0_139] : memref<64x256xbf16, #tpu.memory_space<vmem>>, vector<64x256xbf16>
    %cst_140 = arith.constant dense<0.000000e+00> : vector<8x256xf32>
    %370 = tpu.matmul %368, %369, %cst_140 {dimension_numbers = #tpu.dot_dimension_numbers<[1], [0], [0], [1], [0, 0, 1, 1], [], []>} : vector<8x64xbf16>, vector<64x256xbf16>, vector<8x256xf32> -> vector<8x256xf32>
    %c0_141 = arith.constant 0 : index
    %c0_142 = arith.constant 0 : index
    %371 = vector.load %arg6[%c0_141, %c0_142] : memref<1x256xf32, #tpu.memory_space<vmem>>, vector<1x256xf32>
    %372 = vector.broadcast %371 : vector<1x256xf32> to vector<8x256xf32>
    %373 = arith.addf %370, %372 : vector<8x256xf32>
    %374 = arith.truncf %345 : vector<8x64xf32> to vector<8x64xbf16>
    %c0_143 = arith.constant 0 : index
    %c0_144 = arith.constant 0 : index
    %375 = vector.load %arg2[%c0_143, %c0_144] : memref<64x256xbf16, #tpu.memory_space<vmem>>, vector<64x256xbf16>
    %cst_145 = arith.constant dense<0.000000e+00> : vector<8x256xf32>
    %376 = tpu.matmul %374, %375, %cst_145 {dimension_numbers = #tpu.dot_dimension_numbers<[1], [0], [0], [1], [0, 0, 1, 1], [], []>} : vector<8x64xbf16>, vector<64x256xbf16>, vector<8x256xf32> -> vector<8x256xf32>
    %c56 = arith.constant 56 : index
    %c0_146 = arith.constant 0 : index
    %377 = vector.load %arg14[%c56, %c0_146] : memref<64x256xf32, #tpu.memory_space<vmem>>, vector<8x256xf32>
    %378 = arith.addf %376, %377 : vector<8x256xf32>
    %379 = vector.extract_strided_slice %378 {offsets = [0, 0], sizes = [8, 192], strides = [1, 1]} : vector<8x256xf32> to vector<8x192xf32>
    %cst_147 = arith.constant 5.000000e-01 : f32
    %380 = vector.broadcast %cst_147 : f32 to vector<8x192xf32>
    %381 = arith.mulf %380, %379 : vector<8x192xf32>
    %382 = math.tanh %381 : vector<8x192xf32>
    %cst_148 = arith.constant 5.000000e-01 : f32
    %383 = vector.broadcast %cst_148 : f32 to vector<8x192xf32>
    %384 = arith.mulf %383, %382 : vector<8x192xf32>
    %cst_149 = arith.constant 5.000000e-01 : f32
    %385 = vector.broadcast %cst_149 : f32 to vector<8x192xf32>
    %386 = arith.addf %384, %385 : vector<8x192xf32>
    %387 = vector.extract_strided_slice %378 {offsets = [0, 192], sizes = [8, 64], strides = [1, 1]} : vector<8x256xf32> to vector<8x64xf32>
    %388 = math.tanh %387 : vector<8x64xf32>
    %389 = vector.extract_strided_slice %386 {offsets = [0, 0], sizes = [8, 64], strides = [1, 1]} : vector<8x192xf32> to vector<8x64xf32>
    %390 = vector.extract_strided_slice %386 {offsets = [0, 64], sizes = [8, 64], strides = [1, 1]} : vector<8x192xf32> to vector<8x64xf32>
    %391 = vector.extract_strided_slice %386 {offsets = [0, 128], sizes = [8, 64], strides = [1, 1]} : vector<8x192xf32> to vector<8x64xf32>
    %392 = arith.mulf %390, %343 : vector<8x64xf32>
    %393 = arith.mulf %389, %388 : vector<8x64xf32>
    %394 = arith.addf %392, %393 : vector<8x64xf32>
    %395 = math.tanh %394 : vector<8x64xf32>
    %396 = arith.mulf %391, %395 : vector<8x64xf32>
    %397 = arith.truncf %396 : vector<8x64xf32> to vector<8x64xbf16>
    %c0_150 = arith.constant 0 : index
    %c0_151 = arith.constant 0 : index
    %398 = vector.load %arg4[%c0_150, %c0_151] : memref<64x256xbf16, #tpu.memory_space<vmem>>, vector<64x256xbf16>
    %cst_152 = arith.constant dense<0.000000e+00> : vector<8x256xf32>
    %399 = tpu.matmul %397, %398, %cst_152 {dimension_numbers = #tpu.dot_dimension_numbers<[1], [0], [0], [1], [0, 0, 1, 1], [], []>} : vector<8x64xbf16>, vector<64x256xbf16>, vector<8x256xf32> -> vector<8x256xf32>
    %400 = arith.addf %399, %373 : vector<8x256xf32>
    %401 = vector.extract_strided_slice %400 {offsets = [0, 0], sizes = [8, 192], strides = [1, 1]} : vector<8x256xf32> to vector<8x192xf32>
    %cst_153 = arith.constant 5.000000e-01 : f32
    %402 = vector.broadcast %cst_153 : f32 to vector<8x192xf32>
    %403 = arith.mulf %402, %401 : vector<8x192xf32>
    %404 = math.tanh %403 : vector<8x192xf32>
    %cst_154 = arith.constant 5.000000e-01 : f32
    %405 = vector.broadcast %cst_154 : f32 to vector<8x192xf32>
    %406 = arith.mulf %405, %404 : vector<8x192xf32>
    %cst_155 = arith.constant 5.000000e-01 : f32
    %407 = vector.broadcast %cst_155 : f32 to vector<8x192xf32>
    %408 = arith.addf %406, %407 : vector<8x192xf32>
    %409 = vector.extract_strided_slice %400 {offsets = [0, 192], sizes = [8, 64], strides = [1, 1]} : vector<8x256xf32> to vector<8x64xf32>
    %410 = math.tanh %409 : vector<8x64xf32>
    %411 = vector.extract_strided_slice %408 {offsets = [0, 0], sizes = [8, 64], strides = [1, 1]} : vector<8x192xf32> to vector<8x64xf32>
    %412 = vector.extract_strided_slice %408 {offsets = [0, 64], sizes = [8, 64], strides = [1, 1]} : vector<8x192xf32> to vector<8x64xf32>
    %413 = vector.extract_strided_slice %408 {offsets = [0, 128], sizes = [8, 64], strides = [1, 1]} : vector<8x192xf32> to vector<8x64xf32>
    %414 = arith.mulf %412, %365 : vector<8x64xf32>
    %415 = arith.mulf %411, %410 : vector<8x64xf32>
    %416 = arith.addf %414, %415 : vector<8x64xf32>
    %417 = math.tanh %416 : vector<8x64xf32>
    %418 = arith.mulf %413, %417 : vector<8x64xf32>
    %c0_156 = arith.constant 0 : index
    %c0_157 = arith.constant 0 : index
    %419 = vector.load %arg7[%c0_156, %c0_157] : memref<64x32xf32, #tpu.memory_space<vmem>>, vector<64x32xf32>
    %cst_158 = arith.constant dense<0.000000e+00> : vector<8x32xf32>
    %420 = tpu.matmul %418, %419, %cst_158 {dimension_numbers = #tpu.dot_dimension_numbers<[1], [0], [0], [1], [0, 0, 1, 1], [], []>} : vector<8x64xf32>, vector<64x32xf32>, vector<8x32xf32> -> vector<8x32xf32>
    %c0_159 = arith.constant 0 : index
    %c0_160 = arith.constant 0 : index
    %421 = vector.load %arg8[%c0_159, %c0_160] : memref<1x32xf32, #tpu.memory_space<vmem>>, vector<1x32xf32>
    %422 = vector.broadcast %421 : vector<1x32xf32> to vector<8x32xf32>
    %423 = arith.addf %420, %422 : vector<8x32xf32>
    %cst_161 = arith.constant 0.000000e+00 : f32
    %424 = vector.broadcast %cst_161 : f32 to vector<8x32xf32>
    %425 = arith.maximumf %423, %424 : vector<8x32xf32>
    %c0_162 = arith.constant 0 : index
    %c0_163 = arith.constant 0 : index
    %426 = vector.load %arg9[%c0_162, %c0_163] : memref<32x16xf32, #tpu.memory_space<vmem>>, vector<32x16xf32>
    %cst_164 = arith.constant dense<0.000000e+00> : vector<8x16xf32>
    %427 = tpu.matmul %425, %426, %cst_164 {dimension_numbers = #tpu.dot_dimension_numbers<[1], [0], [0], [1], [0, 0, 1, 1], [], []>} : vector<8x32xf32>, vector<32x16xf32>, vector<8x16xf32> -> vector<8x16xf32>
    %c0_165 = arith.constant 0 : index
    %c0_166 = arith.constant 0 : index
    %428 = vector.load %arg10[%c0_165, %c0_166] : memref<1x16xf32, #tpu.memory_space<vmem>>, vector<1x16xf32>
    %429 = vector.broadcast %428 : vector<1x16xf32> to vector<8x16xf32>
    %430 = arith.addf %427, %429 : vector<8x16xf32>
    %cst_167 = arith.constant 0.000000e+00 : f32
    %431 = vector.broadcast %cst_167 : f32 to vector<8x16xf32>
    %432 = arith.maximumf %430, %431 : vector<8x16xf32>
    %c0_168 = arith.constant 0 : index
    %c0_169 = arith.constant 0 : index
    %433 = vector.load %arg11[%c0_168, %c0_169] : memref<16x1xf32, #tpu.memory_space<vmem>>, vector<16x1xf32>
    %cst_170 = arith.constant dense<0.000000e+00> : vector<8x1xf32>
    %434 = tpu.matmul %432, %433, %cst_170 {dimension_numbers = #tpu.dot_dimension_numbers<[1], [0], [0], [1], [0, 0, 1, 1], [], []>} : vector<8x16xf32>, vector<16x1xf32>, vector<8x1xf32> -> vector<8x1xf32>
    %c0_171 = arith.constant 0 : index
    %c0_172 = arith.constant 0 : index
    %435 = vector.load %arg12[%c0_171, %c0_172] : memref<1x1xf32, #tpu.memory_space<vmem>>, vector<1x1xf32>
    %436 = vector.broadcast %435 : vector<1x1xf32> to vector<8x1xf32>
    %437 = arith.addf %434, %436 : vector<8x1xf32>
    %cst_173 = arith.constant 5.000000e-01 : f32
    %438 = vector.broadcast %cst_173 : f32 to vector<8x1xf32>
    %439 = arith.mulf %438, %437 : vector<8x1xf32>
    %440 = math.tanh %439 : vector<8x1xf32>
    %cst_174 = arith.constant 5.000000e-01 : f32
    %441 = vector.broadcast %cst_174 : f32 to vector<8x1xf32>
    %442 = arith.mulf %441, %440 : vector<8x1xf32>
    %cst_175 = arith.constant 5.000000e-01 : f32
    %443 = vector.broadcast %cst_175 : f32 to vector<8x1xf32>
    %444 = arith.addf %442, %443 : vector<8x1xf32>
    %c0_176 = arith.constant 0 : index
    %c0_177 = arith.constant 0 : index
    %445 = vector.load %arg13[%c0_176, %c0_177] : memref<8x1xf32, #tpu.memory_space<vmem>>, vector<8x1xf32>
    tpu.vector_store %arg13[%c0_176, %c0_177], %444 {strides = array<i32>} : memref<8x1xf32, #tpu.memory_space<vmem>>, vector<8x1xf32>,
    return
  }
}

</mosaic_0001>

<bundles_post_ra>
// kernel: tpu_custom_call.1
= control target key start
LH: loop header
LB: loop body
LE: loop exit
PB: predicated region body
PF: predicated region fallthrough
CT: control target
= control target key end

     0   :  { %s3482_s0 = inlined_call_operand.vmem [shape: bf16[64,4], index: 0, kind: input, shape index: {}]   ;;  %s3483_s1 = inlined_call_operand.hbm [shape: bf16[4,256], index: 1, kind: input, shape index: {}]   ;;  %s3484_s2 = inlined_call_operand.vmem [shape: bf16[64,256], index: 2, kind: input, shape index: {}]   ;;  %s3485_s3 = inlined_call_operand.hbm [shape: f32[1,256], index: 3, kind: input, shape index: {}]   ;;  %s3486_s4 = inlined_call_operand.vmem [shape: bf16[64,256], index: 4, kind: input, shape index: {}]   ;;  %s3487_s5 = inlined_call_operand.vmem [shape: bf16[64,256], index: 5, kind: input, shape index: {}]   ;;  %s3488_s6 = inlined_call_operand.hbm [shape: f32[1,256], index: 6, kind: input, shape index: {}]   ;;  %s3489_s7 = inlined_call_operand.vmem [shape: f32[64,32], index: 7, kind: input, shape index: {}]   ;;  %s3490_s8 = inlined_call_operand.vmem [shape: f32[1,32], index: 8, kind: input, shape index: {}]   ;;  %s3491_s9 = inlined_call_operand.vmem [shape: f32[32,16], index: 9, kind: input, shape index: {}]   ;;  %s3492_s10 = inlined_call_operand.vmem [shape: f32[1,16], index: 10, kind: input, shape index: {}]   ;;  %s3493_s11 = inlined_call_operand.vmem [shape: f32[16,1], index: 11, kind: input, shape index: {}]   ;;  %s3494_s12 = inlined_call_operand.<no memory space> [shape: f32[1,1], index: 12, kind: input, shape index: {}]   ;;  %s3495_s13 = inlined_call_operand.vmem [shape: f32[8,1], index: 13, kind: output, shape index: {}]  }
   0x1   :  { %v18_v0 = vstv %s3494_s12 }
   0x2   :  { %19 = vst [vmem:[#allocation3] sm:$0x1] %v18_v0 }
   0x3   :  { %20 = vsyncpa [#allocation5], 0 }
   0x4   :  { %21 = vsyncpa [#allocation7], 0  ;;  %s2604_s27 = smov [#allocation6]   ;;  %s2605_s29 = smov [#allocation4]  }
   0x5   :  { %s42_s28 = sshll.u32 %s2604_s27, 4  ;;  %s30_s30 = sshll.u32 %s2605_s29, 4  ;;  %s43_s28 = int_to_ptr.vmem [resolvable:$true] %s42_s28  ;;  %s31_s30 = int_to_ptr.vmem [resolvable:$true] %s30_s30 }
   0x6   :  { %s2534_s16 = scalar_lea.hbm %s3485_s3, 32 }
   0x7   :  { %p2535_p0 = scmp.ne.s32.totalorder %s3485_s3, %s2534_s16  ;;  %p2538_p1 = scmp.lt.u32.totalorder %s2534_s16, %s3485_s3 }
   0x9   :  { %p2540_p2 = pnand %p2538_p1, %p2535_p0 }
   0xb   :  { %2543 = shalt.err (!%p2540_p2)
}
   0xc   :  { %s2544_s12 = scalar_lea.vmem %s43_s28, 32  ;;  %p2549_p4 = scmp.lt.s32.totalorder %s43_s28, %s43_s28 }
   0xd   :  { %p2545_p3 = scmp.ne.s32.totalorder %s43_s28, %s2544_s12  ;;  %p2550_p5 = scmp.lt.s32.totalorder %s2544_s12, %s2544_s12 }
   0xf   :  { %p2551_p6 = por %p2550_p5, %p2549_p4 }
  0x11   :  { %p2552_p7 = pnand %p2551_p6, %p2545_p3 }
  0x13   :  { %2555 = shalt.err (!%p2552_p7)
}
  0x14   :  { %45 = dma.hbm_to_vmem [thread:$0]  %s3485_s3, 32, %s43_s28, [#allocation7]  }
  0x15   :  { %s2556_s25 = scalar_lea.hbm %s3483_s1, 64 }
  0x16   :  { %p2557_p8 = scmp.ne.s32.totalorder %s3483_s1, %s2556_s25  ;;  %p2560_p9 = scmp.lt.u32.totalorder %s2556_s25, %s3483_s1 }
  0x18   :  { %p2562_p10 = pnand %p2560_p9, %p2557_p8 }
  0x1a   :  { %2565 = shalt.err (!%p2562_p10)
}
  0x1b   :  { %s2566_s15 = scalar_lea.vmem %s31_s30, 64  ;;  %p2571_p12 = scmp.lt.s32.totalorder %s31_s30, %s31_s30 }
  0x1c   :  { %p2567_p11 = scmp.ne.s32.totalorder %s31_s30, %s2566_s15  ;;  %p2572_p13 = scmp.lt.s32.totalorder %s2566_s15, %s2566_s15 }
  0x1e   :  { %p2573_p0 = por %p2572_p13, %p2571_p12 }
  0x20   :  { %p2574_p1 = pnand %p2573_p0, %p2567_p11 }
  0x22   :  { %2577 = shalt.err (!%p2574_p1)
}
  0x23   :  { %33 = dma.hbm_to_vmem [thread:$0]  %s3483_s1, 64, %s31_s30, [#allocation5]  }
  0x24   :  { %s2606_s16 = smov [#allocation8]   ;;  %s2578_s20 = scalar_lea.hbm %s3488_s6, 32 }
  0x25   :  { %s56_s17 = sshll.u32 %s2606_s16, 4  ;;  %p2579_p2 = scmp.ne.s32.totalorder %s3488_s6, %s2578_s20  ;;  %s57_s17 = int_to_ptr.vmem [resolvable:$true] %s56_s17 }
  0x26   :  { %p2582_p3 = scmp.lt.u32.totalorder %s2578_s20, %s3488_s6 }
  0x28   :  { %p2584_p4 = pnand %p2582_p3, %p2579_p2 }
  0x2a   :  { %2587 = shalt.err (!%p2584_p4)
}
  0x2b   :  { %s2588_s24 = scalar_lea.vmem %s57_s17, 32  ;;  %p2593_p6 = scmp.lt.s32.totalorder %s57_s17, %s57_s17 }
  0x2c   :  { %p2589_p5 = scmp.ne.s32.totalorder %s57_s17, %s2588_s24  ;;  %p2594_p7 = scmp.lt.s32.totalorder %s2588_s24, %s2588_s24 }
  0x2e   :  { %p2595_p8 = por %p2594_p7, %p2593_p6 }
  0x30   :  { %p2596_p9 = pnand %p2595_p8, %p2589_p5 }
  0x32   :  { %2599 = shalt.err (!%p2596_p9)
}
  0x33   :  { %59 = dma.hbm_to_vmem [thread:$0]  %s3488_s6, 32, %s57_s17, [#allocation7]  }
  0x34   :  { %2600 = dma.done.wait [#allocation5], 64  }
  0x35   :  { %2601 = vsyncadd [#allocation5], 4294967232 }
  0x36   :  { %2602 = dma.done.wait [#allocation7], 64  }
  0x37   :  { %2603 = vsyncadd [#allocation7], 4294967232  ;;  %v2607_v1 = vmov 0   ;;  %v2726_v2 = vld [vmem:[%s3487_s5 + $0x4] ss:$8 sps:$4 sm:$0xff]   ;;  %vm145_vm0 = vcmask 1041408   ;;  %v93_v22 = vlaneseq }
  0x38   :  { %337 = vmatprep.mubr.bf16.mxu1 %v2607_v1  ;;  %184 = vmatprep.mubr.bf16.mxu0 %v2607_v1  ;;  %v2731_v3 = vld [vmem:[%s3487_s5] ss:$8 sps:$4 sm:$0xff]   ;;  %v2737_v4 = vld [vmem:[%s3487_s5 + $0x14] ss:$8 sps:$4 sm:$0xff]   ;;  %v2743_v5 = vld [vmem:[%s3487_s5 + $0x10] ss:$8 sps:$4 sm:$0xff]  }
  0x39   :  { %305 = vmatprep.subr.bf16.mxu1 %v2726_v2  ;;  %v2749_v6 = vld [vmem:[%s3487_s5 + $0x24] ss:$8 sps:$4 sm:$0xff]   ;;  %v2755_v7 = vld [vmem:[%s3487_s5 + $0x20] ss:$8 sps:$4 sm:$0xff]   ;;  %v2760_v8 = vld [vmem:[%s3487_s5 + $0x34] ss:$8 sps:$4 sm:$0xff]  }
  0x3a   :  { %306 = vmatpush1.bf16.msra.mxu1 %v2731_v3  ;;  %v2151_v9 = vld.sshfl [vmem:[#allocation4] sm:$0x33 pattern:$0x76325410]  ;;  %v2767_v12 = vld [vmem:[%s3487_s5 + $0x30] ss:$8 sps:$4 sm:$0xff]  }
  0x3b   :  { %307 = vmatprep.subr.bf16.mxu1 %v2737_v4  ;;  %v131_v10 = vcombine.high %v2151_v9, %v2151_v9  ;;  %v147_v11 = vsel %vm145_vm0, %v2151_v9, 0  ;;  %v2361_v13 = vld [vmem:[%s3482_s0] sm:$0xff]   ;;  %vm132_vm1 = vcmask 31744   ;;  %v2787_v16 = vld [vmem:[%s3484_s2 + $0x14] ss:$8 sps:$4 sm:$0xff]   ;;  %v2841_v27 = vshrl.u32 %v93_v22, 7 }
  0x3c   :  { %v2776_v14 = vld [vmem:[%s3484_s2 + $0x4] ss:$8 sps:$4 sm:$0xff]   ;;  %v2781_v15 = vld [vmem:[%s3484_s2] ss:$8 sps:$4 sm:$0xff]   ;;  %v2800_v17 = vld [vmem:[%s3484_s2 + $0x10] ss:$8 sps:$4 sm:$0xff]  }
  0x3d   :  { %2152 = vmatprep.subr.msk.bf16.mxu0 %vm145_vm0, %v131_v10  ;;  %v2807_v18 = vld [vmem:[%s3484_s2 + $0x24] ss:$8 sps:$4 sm:$0xff]   ;;  %v2815_v19 = vld [vmem:[%s3484_s2 + $0x20] ss:$8 sps:$4 sm:$0xff]   ;;  %v2821_v20 = vld [vmem:[%s3484_s2 + $0x34] ss:$8 sps:$4 sm:$0xff]  }
  0x3e   :  { %308 = vmatpush1.bf16.msra.mxu1 %v2743_v5  ;;  %153 = vmatpush1.bf16.msra.mxu0 %v147_v11  ;;  %v2829_v21 = vld [vmem:[%s3484_s2 + $0x30] ss:$8 sps:$4 sm:$0xff]   ;;  %v95_v28 = vsub.s32 0, %v2841_v27  ;;  %v91_v29 = vld [vmem:[#allocation6] sm:$0x3]  ;;  %v99_v30 = vsub.s32 1, %v2841_v27 }
  0x3f   :  { %309 = vmatprep.subr.bf16.mxu1 %v2749_v6  ;;  %586 = vmatprep.subr.bf16.mxu0 %v2726_v2  ;;  %s2608_s20 = smov 64   ;;  %v2860_v48 = vld [vmem:[%s3486_s4 + $0x4] ss:$8 sps:$4 sm:$0xff]   ;;  %v2865_v49 = vld [vmem:[%s3486_s4] ss:$8 sps:$4 sm:$0xff]   ;;  %vm301_vm2 = vcmask 523264  }
  0x40   :  { %v2847_v31 = vrot.slane %v91_v29, %v95_v28  ;;  %v2851_v32 = vrot.slane %v91_v29, %v99_v30  ;;  %v2870_v50 = vld [vmem:[%s3486_s4 + $0x14] ss:$8 sps:$4 sm:$0xff]   ;;  %v2877_v51 = vld [vmem:[%s3486_s4 + $0x10] ss:$8 sps:$4 sm:$0xff]   ;;  %v2883_v52 = vld [vmem:[%s3486_s4 + $0x24] ss:$8 sps:$4 sm:$0xff]  }
  0x41   :  { %2153 = vmatmul.mubr.msk.bf16.vlgmr.msra.gmra.mrb[0].mxu0 %vm132_vm1, %v2361_v13  ;;  %v2889_v53 = vld [vmem:[%s3486_s4 + $0x20] ss:$8 sps:$4 sm:$0xff]   ;;  %v2896_v55 = vld [vmem:[%s3486_s4 + $0x34] ss:$8 sps:$4 sm:$0xff]   ;;  %v2901_v57 = vld [vmem:[%s3486_s4 + $0x30] ss:$8 sps:$4 sm:$0xff]  }
  0x42   :  { %310 = vmatpush1.bf16.msra.mxu1 %v2755_v7  ;;  %587 = vmatpush1.bf16.msra.mxu0 %v2731_v3  ;;  %v249_v11 = vld [vmem:[#allocation8] sm:$0x3]  ;;  %v2378_v27 = vld [vmem:[%s3482_s0 + $0x10] sm:$0xff]   ;;  %vm2610_vm3 = vmmov 0   ;;  %vm1977_vm4 = vcmask 261120   ;;  %vm2061_vm5 = vcmask 130048  }
  0x43   :  { %311 = vmatprep.subr.bf16.mxu1 %v2760_v8  ;;  %194 = vmatprep.mubr.bf16.mxu0 %v2607_v1  ;;  %v2925_v13 = vrot.slane %v249_v11, %v99_v30  ;;  %vm2139_vm6 = vcmask 7168  }
  0x44   :  { %588 = vmatprep.subr.bf16.mxu0 %v2737_v4 }
  0x46   :  { %312 = vmatpush1.bf16.msra.mxu1 %v2767_v12  ;;  %589 = vmatpush1.bf16.msra.mxu0 %v2743_v5 }
  0x47   :  { %396 = vmatprep.subr.bf16.mxu1 %v2776_v14  ;;  %590 = vmatprep.subr.bf16.mxu0 %v2749_v6 }
  0x49   :  { %338 = vmatmul.mubr.bf16.vlgmr.msra.gmra.mrb[0].mxu1 %v2607_v1 }
  0x4a   :  { %397 = vmatpush1.bf16.msra.mxu1 %v2781_v15  ;;  %428 = vmatprep.mubr.bf16.mxu1 %v2607_v1 }
  0x4b   :  { %398 = vmatprep.subr.bf16.mxu1 %v2787_v16  ;;  %591 = vmatpush1.bf16.msra.mxu0 %v2755_v7 }
  0x4c   :  { %592 = vmatprep.subr.bf16.mxu0 %v2760_v8 }
  0x4e   :  { %399 = vmatpush1.bf16.msra.mxu1 %v2800_v17 }
  0x4f   :  { %400 = vmatprep.subr.bf16.mxu1 %v2807_v18  ;;  %593 = vmatpush1.bf16.msra.mxu0 %v2767_v12 }
  0x50   :  { %629 = vmatprep.subr.bf16.mxu0 %v2776_v14 }
  0x52   :  { %401 = vmatpush1.bf16.msra.mxu1 %v2815_v19 }
  0x53   :  { %402 = vmatprep.subr.bf16.mxu1 %v2821_v20 }
  0x56   :  { %403 = vmatpush1.bf16.msra.mxu1 %v2829_v21 }
  0x57   :  { %515 = vmatprep.subr.bf16.mxu1 %v2860_v48 }
  0x59   :  { %429 = vmatmul.mubr.bf16.vlgmr.msra.gmra.mrb[4].mxu1 %v2607_v1 }
  0x5a   :  { %547 = vmatprep.mubr.bf16.mxu1 %v2607_v1  ;;  %516 = vmatpush1.bf16.msra.mxu1 %v2865_v49 }
  0x5b   :  { %517 = vmatprep.subr.bf16.mxu1 %v2870_v50 }
  0x5e   :  { %518 = vmatpush1.bf16.msra.mxu1 %v2877_v51 }
  0x5f   :  { %519 = vmatprep.subr.bf16.mxu1 %v2883_v52 }
  0x62   :  { %520 = vmatpush1.bf16.msra.mxu1 %v2889_v53 }
  0x63   :  { %521 = vmatprep.subr.bf16.mxu1 %v2896_v55 }
  0x66   :  { %522 = vmatpush1.bf16.msra.mxu1 %v2901_v57 }
  0x67   :  { %771 = vmatprep.subr.bf16.mxu1 %v2726_v2 }
 0x114   :  { %v186_v23 = vpop.f32.mrb[0].mxu0 }
 0x115   :  { %v188_v24 = vpop.f32.mrb[1].mxu0  ;;  %v187_v33 = vadd.f32 %v186_v23, %v2847_v31 }
 0x116   :  { %v2837_v25 = vpop.f32.mrb[2].mxu0  ;;  %v189_v34 = vadd.f32 %v188_v24, %v2851_v32 }
 0x117   :  { %v2839_v26 = vpop.f32.mrb[3].mxu0 }
 0x12c   :  { %v430_v35 = vpop.f32.mrb[4].mxu1 }
 0x12d   :  { %v431_v36 = vadd.f32 %v430_v35, %v187_v33  ;;  %v432_v37 = vpop.f32.mrb[5].mxu1  ;;  %v2931_v35 = vrot.slane %v249_v11, %v95_v28  ;;  %v2379_v28 = vld [vmem:[%s3482_s0 + $0x18] sm:$0xff]  }
 0x12e   :  { %v433_v38 = vadd.f32 %v432_v37, %v189_v34  ;;  %v434_v39 = vpop.f32.mrb[6].mxu1 }
 0x12f   :  { %v435_v40 = vpop.f32.mrb[7].mxu1  ;;  %v437_v42 = vmul.f32 0.5, %v431_v36 }
 0x130   :  { %2380 = vtanh.f32 %v433_v38  ;;  %v438_v60 = vmul.f32 0.5, %v433_v38 }
 0x131   :  { %2382 = vtanh.f32 %v437_v42  ;;  %v2377_v42 = vld [vmem:[%s3482_s0 + $0x8] sm:$0xff]  }
 0x132   :  { %2154 = vmatmul.mubr.msk.bf16.gmra.mrb[4].mxu0 %vm132_vm1, %v2377_v42 }
 0x133   :  { %204 = vmatprep.mubr.bf16.mxu0 %v2607_v1 }
 0x13a   :  { %v2381_v41 = vpop.eup %2380  ;;  %2155 = vmatmul.mubr.msk.bf16.gmra.mrb[8].mxu0 %vm132_vm1, %v2378_v27 }
 0x13b   :  { %448 = vrot.lane.b32.xlu0 %v2381_v41, %s2608_s20  ;;  %v2383_v43 = vpop.eup %2382  ;;  %214 = vmatprep.mubr.bf16.mxu0 %v2607_v1 }
 0x13c   :  { %v441_v44 = vmul.f32 0.5, %v2383_v43 }
 0x13e   :  { %v443_v45 = vadd.f32 0.5, %v441_v44 }
 0x140   :  { %v446_v54 = vmul.f32 0.0, %v443_v45 }
 0x142   :  { %2156 = vmatmul.mubr.msk.bf16.gmra.mrb[12].mxu0 %vm132_vm1, %v2379_v28 }
 0x143   :  { %618 = vmatprep.mubr.bf16.mxu0 %v2607_v1 }
 0x1ad   :  { %v449_v46 = vpop.permute.xlu0 %448 }
 0x1ae   :  { %v451_v47 = vmul.f32 %v449_v46, %v443_v45 }
 0x1b0   :  { %453 = vrot.lane.b32.xlu0 %v451_v47, %s2608_s20 }
 0x205   :  { %v2954_v47 = vpop.f32.mrb[4].mxu0 }
 0x222   :  { %v454_v56 = vpop.permute.xlu0 %453 }
 0x223   :  { %v2903_v58 = vadd.f32 %v454_v56, %v446_v54  ;;  %v2956_v54 = vpop.f32.mrb[5].mxu0 }
 0x224   :  { %v2958_v56 = vpop.f32.mrb[6].mxu0 }
 0x225   :  { %2384 = vtanh.f32 %v2903_v58 }
 0x226   :  { %2386 = vtanh.f32 %v438_v60 }
 0x22f   :  { %v2385_v59 = vpop.eup %2384 }
 0x230   :  { %459 = vrot.lane.b32.xlu1 %v2385_v59, %s2608_s20  ;;  %v2387_v61 = vpop.eup %2386  ;;  %v2960_v59 = vpop.f32.mrb[7].mxu0 }
 0x231   :  { %v442_v62 = vmul.f32 0.5, %v2387_v61  ;;  %v2962_v61 = vpop.f32.mrb[8].mxu0 }
 0x233   :  { %v444_v63 = vadd.f32 0.5, %v442_v62  ;;  %v2964_v62 = vpop.f32.mrb[9].mxu0 }
 0x2a2   :  { %v460_v0 = vpop.permute.xlu1 %459 }
 0x2a3   :  { %v462_v9 = vmul.f32 %v460_v0, %v444_v63  ;;  %v2966_v63 = vpop.f32.mrb[10].mxu0 }
 0x2a4   :  { %v2968_v0 = vpop.f32.mrb[11].mxu0 }
 0x2a5   :  { %v2910_v10 = vpack.c.bf16 %v462_v9, %v462_v9  ;;  %v2970_v9 = vpop.f32.mrb[12].mxu0 }
 0x2a6   :  { %v2972_v11 = vpop.f32.mrb[13].mxu0 }
 0x2a7   :  { %2181 = vmatmul.mubr.msk.bf16.vlgmr.msra.gmra.mrb[0].mxu1 %vm301_vm2, %v2910_v10 }
 0x2a8   :  { %772 = vmatpush1.bf16.msra.mxu1 %v2731_v3  ;;  %803 = vmatprep.mubr.bf16.mxu1 %v2607_v1 }
 0x2a9   :  { %773 = vmatprep.subr.bf16.mxu1 %v2737_v4 }
 0x2ac   :  { %774 = vmatpush1.bf16.msra.mxu1 %v2743_v5 }
 0x2ad   :  { %775 = vmatprep.subr.bf16.mxu1 %v2749_v6 }
 0x2b0   :  { %776 = vmatpush1.bf16.msra.mxu1 %v2755_v7 }
 0x2b1   :  { %777 = vmatprep.subr.bf16.mxu1 %v2760_v8 }
 0x2b4   :  { %778 = vmatpush1.bf16.msra.mxu1 %v2767_v12 }
 0x2b5   :  { %814 = vmatprep.subr.bf16.mxu1 %v2776_v14 }
 0x37a   :  { %v549_v22 = vpop.f32.mrb[0].mxu1 }
 0x37b   :  { %v551_v23 = vpop.f32.mrb[1].mxu1  ;;  %v2284_v36 = vadd.f32 %v549_v22, %v2931_v35  ;;  %v2974_v22 = vpop.f32.mrb[14].mxu0 }
 0x37c   :  { %v2285_v24 = vadd.f32 %v551_v23, %v2925_v13  ;;  %v553_v29 = vpop.f32.mrb[2].mxu1  ;;  %v2976_v23 = vpop.f32.mrb[15].mxu0 }
 0x37d   :  { %v554_v33 = vpop.f32.mrb[3].mxu1  ;;  %v556_v37 = vmul.f32 0.5, %v2284_v36 }
 0x37e   :  { %2388 = vtanh.f32 %v2285_v24  ;;  %v557_v60 = vmul.f32 0.5, %v2285_v24 }
 0x37f   :  { %2390 = vtanh.f32 %v556_v37 }
 0x388   :  { %v2389_v34 = vpop.eup %2388 }
 0x389   :  { %567 = vrot.lane.b32.xlu1 %v2389_v34, %s2608_s20  ;;  %v2391_v30 = vpop.eup %2390 }
 0x38a   :  { %v560_v38 = vmul.f32 0.5, %v2391_v30  ;;  %v193_v30 = vadd.f32 %v2839_v26, %v2851_v32 }
 0x38c   :  { %v562_v39 = vadd.f32 0.5, %v560_v38 }
 0x38e   :  { %v565_v43 = vmul.f32 0.0, %v562_v39 }
 0x3fb   :  { %v568_v40 = vpop.permute.xlu1 %567 }
 0x3fc   :  { %v570_v41 = vmul.f32 %v568_v40, %v562_v39 }
 0x3fe   :  { %572 = vrot.lane.b32.xlu0 %v570_v41, %s2608_s20 }
 0x470   :  { %v573_v44 = vpop.permute.xlu0 %572 }
 0x471   :  { %v2950_v45 = vadd.f32 %v573_v44, %v565_v43 }
 0x473   :  { %2392 = vtanh.f32 %v2950_v45 }
 0x474   :  { %2394 = vtanh.f32 %v557_v60 }
 0x47d   :  { %v2393_v46 = vpop.eup %2392 }
 0x47e   :  { %578 = vrot.lane.b32.xlu1 %v2393_v46, %s2608_s20  ;;  %v2395_v29 = vpop.eup %2394 }
 0x47f   :  { %v561_v33 = vmul.f32 0.5, %v2395_v29 }
 0x481   :  { %v563_v24 = vadd.f32 0.5, %v561_v33 }
 0x4f0   :  { %v579_v34 = vpop.permute.xlu1 %578 }
 0x4f1   :  { %v581_v36 = vmul.f32 %v579_v34, %v563_v24 }
 0x4f3   :  { %v582_v37 = vpack.c.bf16 %v581_v36, %v581_v36 }
 0x4f5   :  { %2182 = vmatmul.mubr.msk.bf16.vlgmr.msra.gmra.mrb[16].mxu0 %vm301_vm2, %v582_v37 }
 0x4f6   :  { %630 = vmatpush1.bf16.msra.mxu0 %v2781_v15  ;;  %661 = vmatprep.mubr.bf16.mxu0 %v2607_v1 }
 0x4f7   :  { %631 = vmatprep.subr.bf16.mxu0 %v2787_v16 }
 0x4fa   :  { %632 = vmatpush1.bf16.msra.mxu0 %v2800_v17 }
 0x4fb   :  { %633 = vmatprep.subr.bf16.mxu0 %v2807_v18 }
 0x4fe   :  { %634 = vmatpush1.bf16.msra.mxu0 %v2815_v19 }
 0x4ff   :  { %635 = vmatprep.subr.bf16.mxu0 %v2821_v20 }
 0x502   :  { %636 = vmatpush1.bf16.msra.mxu0 %v2829_v21 }
 0x503   :  { %700 = vmatprep.subr.bf16.mxu0 %v2860_v48 }
 0x505   :  { %2183 = vmatmul.mubr.msk.bf16.vlgmr.msra.gmra.mrb[20].mxu0 %vm301_vm2, %v2910_v10  ;;  %v191_v10 = vadd.f32 %v2837_v25, %v2847_v31 }
 0x506   :  { %701 = vmatpush1.bf16.msra.mxu0 %v2865_v49  ;;  %732 = vmatprep.mubr.bf16.mxu0 %v2607_v1 }
 0x507   :  { %702 = vmatprep.subr.bf16.mxu0 %v2870_v50 }
 0x50a   :  { %703 = vmatpush1.bf16.msra.mxu0 %v2877_v51 }
 0x50b   :  { %704 = vmatprep.subr.bf16.mxu0 %v2883_v52 }
 0x50e   :  { %705 = vmatpush1.bf16.msra.mxu0 %v2889_v53 }
 0x50f   :  { %706 = vmatprep.subr.bf16.mxu0 %v2896_v55 }
 0x512   :  { %707 = vmatpush1.bf16.msra.mxu0 %v2901_v57 }
 0x513   :  { %956 = vmatprep.subr.bf16.mxu0 %v2726_v2 }
 0x5d8   :  { %v663_v38 = vpop.f32.mrb[20].mxu0 }
 0x5d9   :  { %v664_v39 = vadd.f32 %v663_v38, %v191_v10  ;;  %v665_v40 = vpop.f32.mrb[21].mxu0 }
 0x5da   :  { %v666_v41 = vadd.f32 %v665_v40, %v193_v30  ;;  %v667_v42 = vpop.f32.mrb[22].mxu0 }
 0x5db   :  { %v668_v27 = vpop.f32.mrb[23].mxu0  ;;  %v670_v43 = vmul.f32 0.5, %v664_v39 }
 0x5dc   :  { %2396 = vtanh.f32 %v666_v41  ;;  %v671_v36 = vmul.f32 0.5, %v666_v41 }
 0x5dd   :  { %2398 = vtanh.f32 %v670_v43 }
 0x5e6   :  { %v2397_v28 = vpop.eup %2396 }
 0x5e7   :  { %681 = vrot.lane.b32.xlu0 %v2397_v28, %s2608_s20  ;;  %v2399_v44 = vpop.eup %2398 }
 0x5e8   :  { %v674_v46 = vmul.f32 0.5, %v2399_v44 }
 0x5ea   :  { %v676_v60 = vadd.f32 0.5, %v674_v46 }
 0x5ec   :  { %v679_v26 = vmul.f32 %v676_v60, %v2903_v58 }
 0x659   :  { %v682_v29 = vpop.permute.xlu0 %681 }
 0x65a   :  { %v684_v25 = vmul.f32 %v682_v29, %v676_v60 }
 0x65c   :  { %686 = vrot.lane.b32.xlu1 %v684_v25, %s2608_s20 }
 0x6ce   :  { %v687_v33 = vpop.permute.xlu1 %686 }
 0x6cf   :  { %v3006_v24 = vadd.f32 %v687_v33, %v679_v26 }
 0x6d1   :  { %2400 = vtanh.f32 %v3006_v24 }
 0x6d2   :  { %2402 = vtanh.f32 %v671_v36 }
 0x6db   :  { %v2401_v34 = vpop.eup %2400 }
 0x6dc   :  { %692 = vrot.lane.b32.xlu0 %v2401_v34, %s2608_s20  ;;  %v2403_v37 = vpop.eup %2402 }
 0x6dd   :  { %v675_v10 = vmul.f32 0.5, %v2403_v37 }
 0x6df   :  { %v677_v30 = vadd.f32 0.5, %v675_v10 }
 0x74e   :  { %v693_v38 = vpop.permute.xlu0 %692 }
 0x74f   :  { %v695_v39 = vmul.f32 %v693_v38, %v677_v30 }
 0x751   :  { %v696_v40 = vpack.c.bf16 %v695_v39, %v695_v39 }
 0x753   :  { %2184 = vmatmul.mubr.msk.bf16.vlgmr.msra.gmra.mrb[16].mxu0 %vm301_vm2, %v696_v40 }
 0x754   :  { %957 = vmatpush1.bf16.msra.mxu0 %v2731_v3  ;;  %988 = vmatprep.mubr.bf16.mxu0 %v2607_v1 }
 0x755   :  { %958 = vmatprep.subr.bf16.mxu0 %v2737_v4 }
 0x758   :  { %959 = vmatpush1.bf16.msra.mxu0 %v2743_v5 }
 0x759   :  { %960 = vmatprep.subr.bf16.mxu0 %v2749_v6 }
 0x75c   :  { %961 = vmatpush1.bf16.msra.mxu0 %v2755_v7 }
 0x75d   :  { %962 = vmatprep.subr.bf16.mxu0 %v2760_v8 }
 0x760   :  { %963 = vmatpush1.bf16.msra.mxu0 %v2767_v12 }
 0x761   :  { %999 = vmatprep.subr.bf16.mxu0 %v2776_v14 }
 0x826   :  { %v734_v58 = vpop.f32.mrb[16].mxu0 }
 0x827   :  { %v736_v41 = vpop.f32.mrb[17].mxu0  ;;  %v2286_v44 = vadd.f32 %v734_v58, %v2931_v35 }
 0x828   :  { %v2287_v42 = vadd.f32 %v736_v41, %v2925_v13  ;;  %v738_v27 = vpop.f32.mrb[18].mxu0 }
 0x829   :  { %v739_v28 = vpop.f32.mrb[19].mxu0  ;;  %v741_v46 = vmul.f32 0.5, %v2286_v44 }
 0x82a   :  { %2404 = vtanh.f32 %v2287_v42  ;;  %v742_v30 = vmul.f32 0.5, %v2287_v42 }
 0x82b   :  { %2406 = vtanh.f32 %v741_v46 }
 0x834   :  { %v2405_v43 = vpop.eup %2404 }
 0x835   :  { %752 = vrot.lane.b32.xlu1 %v2405_v43, %s2608_s20  ;;  %v2407_v60 = vpop.eup %2406 }
 0x836   :  { %v745_v29 = vmul.f32 0.5, %v2407_v60 }
 0x838   :  { %v747_v25 = vadd.f32 0.5, %v745_v29 }
 0x83a   :  { %v750_v34 = vmul.f32 %v747_v25, %v2950_v45  ;;  %v197_v45 = vadd.f32 %v2954_v47, %v2847_v31 }
 0x8a7   :  { %v753_v26 = vpop.permute.xlu1 %752 }
 0x8a8   :  { %v755_v33 = vmul.f32 %v753_v26, %v747_v25 }
 0x8aa   :  { %757 = vrot.lane.b32.xlu0 %v755_v33, %s2608_s20 }
 0x91c   :  { %v758_v36 = vpop.permute.xlu0 %757 }
 0x91d   :  { %v3025_v37 = vadd.f32 %v758_v36, %v750_v34 }
 0x91f   :  { %2408 = vtanh.f32 %v3025_v37 }
 0x920   :  { %2410 = vtanh.f32 %v742_v30 }
 0x929   :  { %v2409_v10 = vpop.eup %2408 }
 0x92a   :  { %763 = vrot.lane.b32.xlu1 %v2409_v10, %s2608_s20  ;;  %v2411_v38 = vpop.eup %2410 }
 0x92b   :  { %v746_v39 = vmul.f32 0.5, %v2411_v38 }
 0x92d   :  { %v748_v58 = vadd.f32 0.5, %v746_v39 }
 0x99c   :  { %v764_v41 = vpop.permute.xlu1 %763 }
 0x99d   :  { %v766_v27 = vmul.f32 %v764_v41, %v748_v58 }
 0x99f   :  { %v767_v28 = vpack.c.bf16 %v766_v27, %v766_v27 }
 0x9a1   :  { %2185 = vmatmul.mubr.msk.bf16.vlgmr.msra.gmra.mrb[8].mxu1 %vm301_vm2, %v767_v28 }
 0x9a2   :  { %815 = vmatpush1.bf16.msra.mxu1 %v2781_v15  ;;  %846 = vmatprep.mubr.bf16.mxu1 %v2607_v1 }
 0x9a3   :  { %816 = vmatprep.subr.bf16.mxu1 %v2787_v16 }
 0x9a6   :  { %817 = vmatpush1.bf16.msra.mxu1 %v2800_v17 }
 0x9a7   :  { %818 = vmatprep.subr.bf16.mxu1 %v2807_v18 }
 0x9aa   :  { %819 = vmatpush1.bf16.msra.mxu1 %v2815_v19 }
 0x9ab   :  { %820 = vmatprep.subr.bf16.mxu1 %v2821_v20 }
 0x9ae   :  { %821 = vmatpush1.bf16.msra.mxu1 %v2829_v21 }
 0x9af   :  { %885 = vmatprep.subr.bf16.mxu1 %v2860_v48 }
 0x9b1   :  { %2186 = vmatmul.mubr.msk.bf16.vlgmr.msra.gmra.mrb[12].mxu1 %vm301_vm2, %v696_v40  ;;  %v199_v40 = vadd.f32 %v2956_v54, %v2851_v32 }
 0x9b2   :  { %886 = vmatpush1.bf16.msra.mxu1 %v2865_v49  ;;  %917 = vmatprep.mubr.bf16.mxu1 %v2607_v1 }
 0x9b3   :  { %887 = vmatprep.subr.bf16.mxu1 %v2870_v50 }
 0x9b6   :  { %888 = vmatpush1.bf16.msra.mxu1 %v2877_v51 }
 0x9b7   :  { %889 = vmatprep.subr.bf16.mxu1 %v2883_v52 }
 0x9ba   :  { %890 = vmatpush1.bf16.msra.mxu1 %v2889_v53 }
 0x9bb   :  { %891 = vmatprep.subr.bf16.mxu1 %v2896_v55 }
 0x9be   :  { %892 = vmatpush1.bf16.msra.mxu1 %v2901_v57 }
 0x9bf   :  { %1141 = vmatprep.subr.bf16.mxu1 %v2726_v2 }
 0xa84   :  { %v848_v42 = vpop.f32.mrb[12].mxu1 }
 0xa85   :  { %v849_v43 = vadd.f32 %v848_v42, %v197_v45  ;;  %v850_v44 = vpop.f32.mrb[13].mxu1 }
 0xa86   :  { %v851_v46 = vadd.f32 %v850_v44, %v199_v40  ;;  %v852_v60 = vpop.f32.mrb[14].mxu1 }
 0xa87   :  { %v853_v29 = vpop.f32.mrb[15].mxu1  ;;  %v855_v26 = vmul.f32 0.5, %v849_v43 }
 0xa88   :  { %2412 = vtanh.f32 %v851_v46  ;;  %v856_v58 = vmul.f32 0.5, %v851_v46 }
 0xa89   :  { %2414 = vtanh.f32 %v855_v26 }
 0xa92   :  { %v2413_v25 = vpop.eup %2412 }
 0xa93   :  { %866 = vrot.lane.b32.xlu0 %v2413_v25, %s2608_s20  ;;  %v2415_v33 = vpop.eup %2414 }
 0xa94   :  { %v859_v34 = vmul.f32 0.5, %v2415_v33 }
 0xa96   :  { %v861_v36 = vadd.f32 0.5, %v859_v34 }
 0xa98   :  { %v864_v54 = vmul.f32 %v861_v36, %v3006_v24 }
 0xb05   :  { %v867_v10 = vpop.permute.xlu0 %866 }
 0xb06   :  { %v869_v47 = vmul.f32 %v867_v10, %v861_v36 }
 0xb08   :  { %871 = vrot.lane.b32.xlu1 %v869_v47, %s2608_s20 }
 0xb7a   :  { %v872_v30 = vpop.permute.xlu1 %871 }
 0xb7b   :  { %v3056_v38 = vadd.f32 %v872_v30, %v864_v54 }
 0xb7d   :  { %2416 = vtanh.f32 %v3056_v38 }
 0xb7e   :  { %2418 = vtanh.f32 %v856_v58 }
 0xb87   :  { %v2417_v39 = vpop.eup %2416 }
 0xb88   :  { %877 = vrot.lane.b32.xlu0 %v2417_v39, %s2608_s20  ;;  %v2419_v41 = vpop.eup %2418 }
 0xb89   :  { %v860_v27 = vmul.f32 0.5, %v2419_v41 }
 0xb8b   :  { %v862_v28 = vadd.f32 0.5, %v860_v27 }
 0xbfa   :  { %v878_v45 = vpop.permute.xlu0 %877 }
 0xbfb   :  { %v880_v40 = vmul.f32 %v878_v45, %v862_v28 }
 0xbfd   :  { %v881_v42 = vpack.c.bf16 %v880_v40, %v880_v40 }
 0xbff   :  { %2187 = vmatmul.mubr.msk.bf16.vlgmr.msra.gmra.mrb[8].mxu1 %vm301_vm2, %v881_v42 }
 0xc00   :  { %1142 = vmatpush1.bf16.msra.mxu1 %v2731_v3  ;;  %1173 = vmatprep.mubr.bf16.mxu1 %v2607_v1 }
 0xc01   :  { %1143 = vmatprep.subr.bf16.mxu1 %v2737_v4 }
 0xc04   :  { %1144 = vmatpush1.bf16.msra.mxu1 %v2743_v5 }
 0xc05   :  { %1145 = vmatprep.subr.bf16.mxu1 %v2749_v6 }
 0xc08   :  { %1146 = vmatpush1.bf16.msra.mxu1 %v2755_v7 }
 0xc09   :  { %1147 = vmatprep.subr.bf16.mxu1 %v2760_v8 }
 0xc0c   :  { %1148 = vmatpush1.bf16.msra.mxu1 %v2767_v12 }
 0xc0d   :  { %1184 = vmatprep.subr.bf16.mxu1 %v2776_v14 }
 0xcd2   :  { %v919_v24 = vpop.f32.mrb[8].mxu1 }
 0xcd3   :  { %v921_v43 = vpop.f32.mrb[9].mxu1  ;;  %v2288_v25 = vadd.f32 %v919_v24, %v2931_v35 }
 0xcd4   :  { %v2289_v44 = vadd.f32 %v921_v43, %v2925_v13  ;;  %v923_v46 = vpop.f32.mrb[10].mxu1 }
 0xcd5   :  { %v924_v60 = vpop.f32.mrb[11].mxu1  ;;  %v926_v26 = vmul.f32 0.5, %v2288_v25 }
 0xcd6   :  { %2420 = vtanh.f32 %v2289_v44  ;;  %v927_v41 = vmul.f32 0.5, %v2289_v44 }
 0xcd7   :  { %2422 = vtanh.f32 %v926_v26 }
 0xce0   :  { %v2421_v29 = vpop.eup %2420 }
 0xce1   :  { %937 = vrot.lane.b32.xlu1 %v2421_v29, %s2608_s20  ;;  %v2423_v33 = vpop.eup %2422 }
 0xce2   :  { %v930_v34 = vmul.f32 0.5, %v2423_v33 }
 0xce4   :  { %v932_v36 = vadd.f32 0.5, %v930_v34 }
 0xce6   :  { %v935_v54 = vmul.f32 %v932_v36, %v3025_v37  ;;  %v201_v37 = vadd.f32 %v2958_v56, %v2847_v31 }
 0xd53   :  { %v938_v10 = vpop.permute.xlu1 %937 }
 0xd54   :  { %v940_v47 = vmul.f32 %v938_v10, %v932_v36 }
 0xd56   :  { %942 = vrot.lane.b32.xlu0 %v940_v47, %s2608_s20 }
 0xdc8   :  { %v943_v30 = vpop.permute.xlu0 %942 }
 0xdc9   :  { %v3075_v39 = vadd.f32 %v943_v30, %v935_v54 }
 0xdcb   :  { %2424 = vtanh.f32 %v3075_v39 }
 0xdcc   :  { %2426 = vtanh.f32 %v927_v41 }
 0xdd5   :  { %v2425_v58 = vpop.eup %2424 }
 0xdd6   :  { %948 = vrot.lane.b32.xlu1 %v2425_v58, %s2608_s20  ;;  %v2427_v27 = vpop.eup %2426 }
 0xdd7   :  { %v931_v28 = vmul.f32 0.5, %v2427_v27 }
 0xdd9   :  { %v933_v45 = vadd.f32 0.5, %v931_v28 }
 0xe48   :  { %v949_v40 = vpop.permute.xlu1 %948 }
 0xe49   :  { %v951_v24 = vmul.f32 %v949_v40, %v933_v45 }
 0xe4b   :  { %v952_v43 = vpack.c.bf16 %v951_v24, %v951_v24 }
 0xe4d   :  { %2188 = vmatmul.mubr.msk.bf16.vlgmr.msra.gmra.mrb[24].mxu0 %vm301_vm2, %v952_v43 }
 0xe4e   :  { %1000 = vmatpush1.bf16.msra.mxu0 %v2781_v15  ;;  %1031 = vmatprep.mubr.bf16.mxu0 %v2607_v1 }
 0xe4f   :  { %1001 = vmatprep.subr.bf16.mxu0 %v2787_v16 }
 0xe52   :  { %1002 = vmatpush1.bf16.msra.mxu0 %v2800_v17 }
 0xe53   :  { %1003 = vmatprep.subr.bf16.mxu0 %v2807_v18 }
 0xe56   :  { %1004 = vmatpush1.bf16.msra.mxu0 %v2815_v19 }
 0xe57   :  { %1005 = vmatprep.subr.bf16.mxu0 %v2821_v20 }
 0xe5a   :  { %1006 = vmatpush1.bf16.msra.mxu0 %v2829_v21 }
 0xe5b   :  { %1070 = vmatprep.subr.bf16.mxu0 %v2860_v48 }
 0xe5d   :  { %2189 = vmatmul.mubr.msk.bf16.vlgmr.msra.gmra.mrb[28].mxu0 %vm301_vm2, %v881_v42  ;;  %v203_v42 = vadd.f32 %v2960_v59, %v2851_v32 }
 0xe5e   :  { %1071 = vmatpush1.bf16.msra.mxu0 %v2865_v49  ;;  %1102 = vmatprep.mubr.bf16.mxu0 %v2607_v1 }
 0xe5f   :  { %1072 = vmatprep.subr.bf16.mxu0 %v2870_v50 }
 0xe62   :  { %1073 = vmatpush1.bf16.msra.mxu0 %v2877_v51 }
 0xe63   :  { %1074 = vmatprep.subr.bf16.mxu0 %v2883_v52 }
 0xe66   :  { %1075 = vmatpush1.bf16.msra.mxu0 %v2889_v53 }
 0xe67   :  { %1076 = vmatprep.subr.bf16.mxu0 %v2896_v55 }
 0xe6a   :  { %1077 = vmatpush1.bf16.msra.mxu0 %v2901_v57 }
 0xe6b   :  { %1326 = vmatprep.subr.bf16.mxu0 %v2726_v2 }
 0xf30   :  { %v1033_v44 = vpop.f32.mrb[28].mxu0 }
 0xf31   :  { %v1034_v46 = vadd.f32 %v1033_v44, %v201_v37  ;;  %v1035_v60 = vpop.f32.mrb[29].mxu0 }
 0xf32   :  { %v1036_v29 = vadd.f32 %v1035_v60, %v203_v42  ;;  %v1037_v25 = vpop.f32.mrb[30].mxu0 }
 0xf33   :  { %v1038_v26 = vpop.f32.mrb[31].mxu0  ;;  %v1040_v34 = vmul.f32 0.5, %v1034_v46 }
 0xf34   :  { %2428 = vtanh.f32 %v1036_v29  ;;  %v1041_v41 = vmul.f32 0.5, %v1036_v29 }
 0xf35   :  { %2430 = vtanh.f32 %v1040_v34 }
 0xf3e   :  { %v2429_v33 = vpop.eup %2428 }
 0xf3f   :  { %1051 = vrot.lane.b32.xlu0 %v2429_v33, %s2608_s20  ;;  %v2431_v36 = vpop.eup %2430 }
 0xf40   :  { %v1044_v2 = vmul.f32 0.5, %v2431_v36 }
 0xf42   :  { %v1046_v10 = vadd.f32 0.5, %v1044_v2 }
 0xf44   :  { %v1049_v59 = vmul.f32 %v1046_v10, %v3056_v38 }
 0xfb1   :  { %v1052_v47 = vpop.permute.xlu0 %1051 }
 0xfb2   :  { %v1054_v56 = vmul.f32 %v1052_v47, %v1046_v10 }
 0xfb4   :  { %1056 = vrot.lane.b32.xlu1 %v1054_v56, %s2608_s20 }
0x1026   :  { %v1057_v54 = vpop.permute.xlu1 %1056 }
0x1027   :  { %v3106_v30 = vadd.f32 %v1057_v54, %v1049_v59 }
0x1029   :  { %2432 = vtanh.f32 %v3106_v30 }
0x102a   :  { %2434 = vtanh.f32 %v1041_v41 }
0x1033   :  { %v2433_v58 = vpop.eup %2432 }
0x1034   :  { %1062 = vrot.lane.b32.xlu0 %v2433_v58, %s2608_s20  ;;  %v2435_v27 = vpop.eup %2434 }
0x1035   :  { %v1045_v28 = vmul.f32 0.5, %v2435_v27 }
0x1037   :  { %v1047_v45 = vadd.f32 0.5, %v1045_v28 }
0x10a6   :  { %v1063_v40 = vpop.permute.xlu0 %1062 }
0x10a7   :  { %v1065_v24 = vmul.f32 %v1063_v40, %v1047_v45 }
0x10a9   :  { %v1066_v43 = vpack.c.bf16 %v1065_v24, %v1065_v24 }
0x10ab   :  { %2190 = vmatmul.mubr.msk.bf16.vlgmr.msra.gmra.mrb[24].mxu0 %vm301_vm2, %v1066_v43 }
0x10ac   :  { %1327 = vmatpush1.bf16.msra.mxu0 %v2731_v3  ;;  %1358 = vmatprep.mubr.bf16.mxu0 %v2607_v1 }
0x10ad   :  { %1328 = vmatprep.subr.bf16.mxu0 %v2737_v4 }
0x10b0   :  { %1329 = vmatpush1.bf16.msra.mxu0 %v2743_v5 }
0x10b1   :  { %1330 = vmatprep.subr.bf16.mxu0 %v2749_v6 }
0x10b4   :  { %1331 = vmatpush1.bf16.msra.mxu0 %v2755_v7 }
0x10b5   :  { %1332 = vmatprep.subr.bf16.mxu0 %v2760_v8 }
0x10b8   :  { %1333 = vmatpush1.bf16.msra.mxu0 %v2767_v12 }
0x10b9   :  { %1369 = vmatprep.subr.bf16.mxu0 %v2776_v14 }
0x117e   :  { %v1104_v38 = vpop.f32.mrb[24].mxu0 }
0x117f   :  { %v1106_v37 = vpop.f32.mrb[25].mxu0  ;;  %v2290_v5 = vadd.f32 %v1104_v38, %v2931_v35 }
0x1180   :  { %v2291_v3 = vadd.f32 %v1106_v37, %v2925_v13  ;;  %v1108_v42 = vpop.f32.mrb[26].mxu0 }
0x1181   :  { %v1109_v44 = vpop.f32.mrb[27].mxu0  ;;  %v1111_v6 = vmul.f32 0.5, %v2290_v5 }
0x1182   :  { %2436 = vtanh.f32 %v2291_v3  ;;  %v1112_v33 = vmul.f32 0.5, %v2291_v3 }
0x1183   :  { %2438 = vtanh.f32 %v1111_v6  ;;  %v3179_v6 = vld [vmem:[%s3487_s5 + $0x14] ss:$8 sps:$4 sm:$0xff]  }
0x118c   :  { %v2437_v4 = vpop.eup %2436 }
0x118d   :  { %1122 = vrot.lane.b32.xlu1 %v2437_v4, %s2608_s20  ;;  %v2439_v7 = vpop.eup %2438 }
0x118e   :  { %v1115_v8 = vmul.f32 0.5, %v2439_v7  ;;  %v3185_v7 = vld [vmem:[%s3487_s5 + $0x10] ss:$8 sps:$4 sm:$0xff]  }
0x1190   :  { %v1117_v46 = vadd.f32 0.5, %v1115_v8  ;;  %v3191_v8 = vld [vmem:[%s3487_s5 + $0x24] ss:$8 sps:$4 sm:$0xff]  }
0x1192   :  { %v1120_v14 = vmul.f32 %v1117_v46, %v3075_v39 }
0x11ff   :  { %v1123_v12 = vpop.permute.xlu1 %1122 }
0x1200   :  { %v1125_v60 = vmul.f32 %v1123_v12, %v1117_v46  ;;  %v3197_v46 = vld [vmem:[%s3487_s5 + $0x20] ss:$8 sps:$4 sm:$0xff]   ;;  %v3203_v12 = vld [vmem:[%s3487_s5 + $0x34] ss:$8 sps:$4 sm:$0xff]  }
0x1202   :  { %1127 = vrot.lane.b32.xlu0 %v1125_v60, %s2608_s20  ;;  %v3209_v60 = vld [vmem:[%s3487_s5 + $0x30] ss:$8 sps:$4 sm:$0xff]  }
0x1274   :  { %v1128_v29 = vpop.permute.xlu0 %1127 }
0x1275   :  { %v3125_v25 = vadd.f32 %v1128_v29, %v1120_v14  ;;  %v3215_v14 = vld [vmem:[%s3484_s2 + $0x4] ss:$8 sps:$4 sm:$0xff]  }
0x1277   :  { %2440 = vtanh.f32 %v3125_v25 }
0x1278   :  { %2442 = vtanh.f32 %v1112_v33 }
0x1281   :  { %v2441_v26 = vpop.eup %2440 }
0x1282   :  { %1133 = vrot.lane.b32.xlu1 %v2441_v26, %s2608_s20  ;;  %v2443_v34 = vpop.eup %2442 }
0x1283   :  { %v1116_v36 = vmul.f32 0.5, %v2443_v34 }
0x1285   :  { %v1118_v2 = vadd.f32 0.5, %v1116_v36 }
0x12f4   :  { %v1134_v10 = vpop.permute.xlu1 %1133 }
0x12f5   :  { %v1136_v47 = vmul.f32 %v1134_v10, %v1118_v2 }
0x12f7   :  { %v1137_v56 = vpack.c.bf16 %v1136_v47, %v1136_v47 }
0x12f9   :  { %2191 = vmatmul.mubr.msk.bf16.vlgmr.msra.gmra.mrb[16].mxu1 %vm301_vm2, %v1137_v56 }
0x12fa   :  { %1185 = vmatpush1.bf16.msra.mxu1 %v2781_v15  ;;  %1216 = vmatprep.mubr.bf16.mxu1 %v2607_v1  ;;  %v3151_v15 = vld [vmem:[%s3487_s5 + $0x4] ss:$8 sps:$4 sm:$0xff]  }
0x12fb   :  { %1186 = vmatprep.subr.bf16.mxu1 %v2787_v16  ;;  %v207_v16 = vadd.f32 %v2962_v61, %v2847_v31 }
0x12fe   :  { %1187 = vmatpush1.bf16.msra.mxu1 %v2800_v17  ;;  %v209_v17 = vadd.f32 %v2964_v62, %v2851_v32 }
0x12ff   :  { %1188 = vmatprep.subr.bf16.mxu1 %v2807_v18 }
0x1302   :  { %1189 = vmatpush1.bf16.msra.mxu1 %v2815_v19 }
0x1303   :  { %1190 = vmatprep.subr.bf16.mxu1 %v2821_v20 }
0x1306   :  { %1191 = vmatpush1.bf16.msra.mxu1 %v2829_v21 }
0x1307   :  { %1255 = vmatprep.subr.bf16.mxu1 %v2860_v48 }
0x1309   :  { %2192 = vmatmul.mubr.msk.bf16.vlgmr.msra.gmra.mrb[20].mxu1 %vm301_vm2, %v1066_v43 }
0x130a   :  { %1256 = vmatpush1.bf16.msra.mxu1 %v2865_v49  ;;  %1287 = vmatprep.mubr.bf16.mxu1 %v2607_v1 }
0x130b   :  { %1257 = vmatprep.subr.bf16.mxu1 %v2870_v50 }
0x130e   :  { %1258 = vmatpush1.bf16.msra.mxu1 %v2877_v51 }
0x130f   :  { %1259 = vmatprep.subr.bf16.mxu1 %v2883_v52 }
0x1312   :  { %1260 = vmatpush1.bf16.msra.mxu1 %v2889_v53 }
0x1313   :  { %1261 = vmatprep.subr.bf16.mxu1 %v2896_v55 }
0x1316   :  { %1262 = vmatpush1.bf16.msra.mxu1 %v2901_v57 }
0x1317   :  { %1511 = vmatprep.subr.bf16.mxu1 %v3151_v15 }
0x13dc   :  { %v1218_v18 = vpop.f32.mrb[20].mxu1 }
0x13dd   :  { %v1219_v19 = vadd.f32 %v1218_v18, %v207_v16  ;;  %v1220_v20 = vpop.f32.mrb[21].mxu1 }
0x13de   :  { %v1221_v21 = vadd.f32 %v1220_v20, %v209_v17  ;;  %v1222_v39 = vpop.f32.mrb[22].mxu1 }
0x13df   :  { %v1223_v59 = vpop.f32.mrb[23].mxu1  ;;  %v1225_v58 = vmul.f32 0.5, %v1219_v19 }
0x13e0   :  { %2444 = vtanh.f32 %v1221_v21  ;;  %v1226_v38 = vmul.f32 0.5, %v1221_v21 }
0x13e1   :  { %2446 = vtanh.f32 %v1225_v58 }
0x13ea   :  { %v2445_v54 = vpop.eup %2444 }
0x13eb   :  { %1236 = vrot.lane.b32.xlu0 %v2445_v54, %s2608_s20  ;;  %v2447_v41 = vpop.eup %2446 }
0x13ec   :  { %v1229_v27 = vmul.f32 0.5, %v2447_v41 }
0x13ee   :  { %v1231_v28 = vadd.f32 0.5, %v1229_v27 }
0x13f0   :  { %v1234_v62 = vmul.f32 %v1231_v28, %v3106_v30  ;;  %v3172_v30 = vld [vmem:[%s3487_s5] ss:$8 sps:$4 sm:$0xff]  }
0x145d   :  { %v1237_v45 = vpop.permute.xlu0 %1236 }
0x145e   :  { %v1239_v61 = vmul.f32 %v1237_v45, %v1231_v28 }
0x1460   :  { %1241 = vrot.lane.b32.xlu1 %v1239_v61, %s2608_s20 }
0x14d2   :  { %v1242_v40 = vpop.permute.xlu1 %1241 }
0x14d3   :  { %v3161_v24 = vadd.f32 %v1242_v40, %v1234_v62  ;;  %v3238_v62 = vld [vmem:[%s3484_s2 + $0x14] ss:$8 sps:$4 sm:$0xff]   ;;  %v3244_v40 = vld [vmem:[%s3484_s2 + $0x10] ss:$8 sps:$4 sm:$0xff]  }
0x14d5   :  { %2448 = vtanh.f32 %v3161_v24 }
0x14d6   :  { %2450 = vtanh.f32 %v1226_v38  ;;  %v3256_v38 = vld [vmem:[%s3484_s2 + $0x20] ss:$8 sps:$4 sm:$0xff]  }
0x14df   :  { %v2449_v43 = vpop.eup %2448 }
0x14e0   :  { %1247 = vrot.lane.b32.xlu0 %v2449_v43, %s2608_s20  ;;  %v2451_v37 = vpop.eup %2450  ;;  %v3250_v43 = vld [vmem:[%s3484_s2 + $0x24] ss:$8 sps:$4 sm:$0xff]  }
0x14e1   :  { %v1230_v3 = vmul.f32 0.5, %v2451_v37  ;;  %v3262_v37 = vld [vmem:[%s3484_s2 + $0x34] ss:$8 sps:$4 sm:$0xff]  }
0x14e3   :  { %v1232_v42 = vadd.f32 0.5, %v1230_v3  ;;  %v3268_v3 = vld [vmem:[%s3484_s2 + $0x30] ss:$8 sps:$4 sm:$0xff]  }
0x1552   :  { %v1248_v44 = vpop.permute.xlu0 %1247 }
0x1553   :  { %v1250_v4 = vmul.f32 %v1248_v44, %v1232_v42 }
0x1555   :  { %v3165_v5 = vpack.c.bf16 %v1250_v4, %v1250_v4 }
0x1557   :  { %2193 = vmatmul.mubr.msk.bf16.vlgmr.msra.gmra.mrb[16].mxu1 %vm301_vm2, %v3165_v5 }
0x1558   :  { %1512 = vmatpush1.bf16.msra.mxu1 %v3172_v30  ;;  %1543 = vmatprep.mubr.bf16.mxu1 %v2607_v1 }
0x1559   :  { %1513 = vmatprep.subr.bf16.mxu1 %v3179_v6 }
0x155c   :  { %1514 = vmatpush1.bf16.msra.mxu1 %v3185_v7 }
0x155d   :  { %1515 = vmatprep.subr.bf16.mxu1 %v3191_v8 }
0x1560   :  { %1516 = vmatpush1.bf16.msra.mxu1 %v3197_v46 }
0x1561   :  { %1517 = vmatprep.subr.bf16.mxu1 %v3203_v12 }
0x1564   :  { %1518 = vmatpush1.bf16.msra.mxu1 %v3209_v60 }
0x1565   :  { %1554 = vmatprep.subr.bf16.mxu1 %v3215_v14 }
0x162a   :  { %v1289_v29 = vpop.f32.mrb[16].mxu1 }
0x162b   :  { %v1291_v26 = vpop.f32.mrb[17].mxu1  ;;  %v2292_v10 = vadd.f32 %v1289_v29, %v2931_v35 }
0x162c   :  { %v2293_v33 = vadd.f32 %v1291_v26, %v2925_v13  ;;  %v1293_v34 = vpop.f32.mrb[18].mxu1 }
0x162d   :  { %v1294_v36 = vpop.f32.mrb[19].mxu1  ;;  %v1296_v47 = vmul.f32 0.5, %v2292_v10 }
0x162e   :  { %2452 = vtanh.f32 %v2293_v33  ;;  %v1297_v54 = vmul.f32 0.5, %v2293_v33 }
0x162f   :  { %2454 = vtanh.f32 %v1296_v47 }
0x1638   :  { %v2453_v2 = vpop.eup %2452 }
0x1639   :  { %1307 = vrot.lane.b32.xlu1 %v2453_v2, %s2608_s20  ;;  %v2455_v56 = vpop.eup %2454 }
0x163a   :  { %v1300_v16 = vmul.f32 0.5, %v2455_v56 }
0x163c   :  { %v1302_v17 = vadd.f32 0.5, %v1300_v16 }
0x163e   :  { %v1305_v20 = vmul.f32 %v1302_v17, %v3125_v25  ;;  %v3231_v25 = vld [vmem:[%s3484_s2] ss:$8 sps:$4 sm:$0xff]  }
0x16ab   :  { %v1308_v18 = vpop.permute.xlu1 %1307 }
0x16ac   :  { %v1310_v19 = vmul.f32 %v1308_v18, %v1302_v17 }
0x16ae   :  { %1312 = vrot.lane.b32.xlu0 %v1310_v19, %s2608_s20 }
0x1720   :  { %v1313_v21 = vpop.permute.xlu0 %1312 }
0x1721   :  { %v3223_v39 = vadd.f32 %v1313_v21, %v1305_v20 }
0x1723   :  { %2456 = vtanh.f32 %v3223_v39 }
0x1724   :  { %2458 = vtanh.f32 %v1297_v54 }
0x172d   :  { %v2457_v59 = vpop.eup %2456 }
0x172e   :  { %1318 = vrot.lane.b32.xlu1 %v2457_v59, %s2608_s20  ;;  %v2459_v58 = vpop.eup %2458 }
0x172f   :  { %v1301_v41 = vmul.f32 0.5, %v2459_v58 }
0x1731   :  { %v1303_v27 = vadd.f32 0.5, %v1301_v41 }
0x17a0   :  { %v1319_v28 = vpop.permute.xlu1 %1318 }
0x17a1   :  { %v1321_v45 = vmul.f32 %v1319_v28, %v1303_v27 }
0x17a3   :  { %v1322_v61 = vpack.c.bf16 %v1321_v45, %v1321_v45 }
0x17a5   :  { %2194 = vmatmul.mubr.msk.bf16.vlgmr.msra.gmra.mrb[32].mxu0 %vm301_vm2, %v1322_v61 }
0x17a6   :  { %1370 = vmatpush1.bf16.msra.mxu0 %v3231_v25  ;;  %1401 = vmatprep.mubr.bf16.mxu0 %v2607_v1 }
0x17a7   :  { %1371 = vmatprep.subr.bf16.mxu0 %v3238_v62 }
0x17aa   :  { %1372 = vmatpush1.bf16.msra.mxu0 %v3244_v40 }
0x17ab   :  { %1373 = vmatprep.subr.bf16.mxu0 %v3250_v43 }
0x17ae   :  { %1374 = vmatpush1.bf16.msra.mxu0 %v3256_v38 }
0x17af   :  { %1375 = vmatprep.subr.bf16.mxu0 %v3262_v37 }
0x17b2   :  { %1376 = vmatpush1.bf16.msra.mxu0 %v3268_v3 }
0x17b3   :  { %1440 = vmatprep.subr.bf16.mxu0 %v2860_v48  ;;  %v211_v48 = vadd.f32 %v2966_v63, %v2847_v31 }
0x17b5   :  { %2195 = vmatmul.mubr.msk.bf16.vlgmr.msra.gmra.mrb[36].mxu0 %vm301_vm2, %v3165_v5 }
0x17b6   :  { %1441 = vmatpush1.bf16.msra.mxu0 %v2865_v49  ;;  %1472 = vmatprep.mubr.bf16.mxu0 %v2607_v1  ;;  %v213_v49 = vadd.f32 %v2968_v0, %v2851_v32 }
0x17b7   :  { %1442 = vmatprep.subr.bf16.mxu0 %v2870_v50 }
0x17ba   :  { %1443 = vmatpush1.bf16.msra.mxu0 %v2877_v51 }
0x17bb   :  { %1444 = vmatprep.subr.bf16.mxu0 %v2883_v52 }
0x17be   :  { %1445 = vmatpush1.bf16.msra.mxu0 %v2889_v53 }
0x17bf   :  { %1446 = vmatprep.subr.bf16.mxu0 %v2896_v55 }
0x17c2   :  { %1447 = vmatpush1.bf16.msra.mxu0 %v2901_v57 }
0x17c3   :  { %1696 = vmatprep.subr.bf16.mxu0 %v3151_v15 }
0x1888   :  { %v1403_v42 = vpop.f32.mrb[36].mxu0 }
0x1889   :  { %v1404_v50 = vadd.f32 %v1403_v42, %v211_v48  ;;  %v1405_v44 = vpop.f32.mrb[37].mxu0 }
0x188a   :  { %v1406_v51 = vadd.f32 %v1405_v44, %v213_v49  ;;  %v1407_v4 = vpop.f32.mrb[38].mxu0  ;;  %v3339_v44 = vld [vmem:[%s3486_s4 + $0x14] ss:$8 sps:$4 sm:$0xff]  }
0x188b   :  { %v1408_v52 = vpop.f32.mrb[39].mxu0  ;;  %v1410_v55 = vmul.f32 0.5, %v1404_v50  ;;  %v3332_v50 = vld [vmem:[%s3486_s4] ss:$8 sps:$4 sm:$0xff]   ;;  %v3351_v4 = vld [vmem:[%s3486_s4 + $0x24] ss:$8 sps:$4 sm:$0xff]  }
0x188c   :  { %2460 = vtanh.f32 %v1406_v51  ;;  %v1411_v36 = vmul.f32 0.5, %v1406_v51  ;;  %v3345_v51 = vld [vmem:[%s3486_s4 + $0x10] ss:$8 sps:$4 sm:$0xff]   ;;  %v3357_v52 = vld [vmem:[%s3486_s4 + $0x20] ss:$8 sps:$4 sm:$0xff]  }
0x188d   :  { %2462 = vtanh.f32 %v1410_v55  ;;  %v3369_v55 = vld [vmem:[%s3486_s4 + $0x30] ss:$8 sps:$4 sm:$0xff]  }
0x1896   :  { %v2461_v53 = vpop.eup %2460 }
0x1897   :  { %1421 = vrot.lane.b32.xlu0 %v2461_v53, %s2608_s20  ;;  %v2463_v57 = vpop.eup %2462  ;;  %v3363_v53 = vld [vmem:[%s3486_s4 + $0x34] ss:$8 sps:$4 sm:$0xff]  }
0x1898   :  { %v1414_v15 = vmul.f32 0.5, %v2463_v57  ;;  %v217_v57 = vadd.f32 %v2970_v9, %v2847_v31 }
0x189a   :  { %v1416_v5 = vadd.f32 0.5, %v1414_v15  ;;  %v219_v15 = vadd.f32 %v2972_v11, %v2851_v32 }
0x189c   :  { %v1419_v0 = vmul.f32 %v1416_v5, %v3161_v24 }
0x1909   :  { %v1422_v29 = vpop.permute.xlu0 %1421 }
0x190a   :  { %v1424_v63 = vmul.f32 %v1422_v29, %v1416_v5 }
0x190c   :  { %1426 = vrot.lane.b32.xlu1 %v1424_v63, %s2608_s20 }
0x197e   :  { %v1427_v26 = vpop.permute.xlu1 %1426 }
0x197f   :  { %v3290_v33 = vadd.f32 %v1427_v26, %v1419_v0 }
0x1981   :  { %2464 = vtanh.f32 %v3290_v33 }
0x1982   :  { %2466 = vtanh.f32 %v1411_v36 }
0x198b   :  { %v2465_v34 = vpop.eup %2464 }
0x198c   :  { %1432 = vrot.lane.b32.xlu0 %v2465_v34, %s2608_s20  ;;  %v2467_v2 = vpop.eup %2466 }
0x198d   :  { %v1415_v10 = vmul.f32 0.5, %v2467_v2 }
0x198f   :  { %v1417_v47 = vadd.f32 0.5, %v1415_v10 }
0x19fe   :  { %v1433_v56 = vpop.permute.xlu0 %1432 }
0x19ff   :  { %v1435_v16 = vmul.f32 %v1433_v56, %v1417_v47 }
0x1a01   :  { %v1436_v17 = vpack.c.bf16 %v1435_v16, %v1435_v16 }
0x1a03   :  { %2196 = vmatmul.mubr.msk.bf16.vlgmr.msra.gmra.mrb[32].mxu0 %vm301_vm2, %v1436_v17 }
0x1a04   :  { %1697 = vmatpush1.bf16.msra.mxu0 %v3172_v30  ;;  %1728 = vmatprep.mubr.bf16.mxu0 %v2607_v1 }
0x1a05   :  { %1698 = vmatprep.subr.bf16.mxu0 %v3179_v6 }
0x1a08   :  { %1699 = vmatpush1.bf16.msra.mxu0 %v3185_v7 }
0x1a09   :  { %1700 = vmatprep.subr.bf16.mxu0 %v3191_v8 }
0x1a0c   :  { %1701 = vmatpush1.bf16.msra.mxu0 %v3197_v46 }
0x1a0d   :  { %1702 = vmatprep.subr.bf16.mxu0 %v3203_v12 }
0x1a10   :  { %1703 = vmatpush1.bf16.msra.mxu0 %v3209_v60 }
0x1a11   :  { %1739 = vmatprep.subr.bf16.mxu0 %v3215_v14 }
0x1ad6   :  { %v1474_v24 = vpop.f32.mrb[32].mxu0 }
0x1ad7   :  { %v1476_v18 = vpop.f32.mrb[33].mxu0  ;;  %v2294_v7 = vadd.f32 %v1474_v24, %v2931_v35 }
0x1ad8   :  { %v2295_v30 = vadd.f32 %v1476_v18, %v2925_v13  ;;  %v1478_v19 = vpop.f32.mrb[34].mxu0 }
0x1ad9   :  { %v1479_v20 = vpop.f32.mrb[35].mxu0  ;;  %v1481_v8 = vmul.f32 0.5, %v2294_v7 }
0x1ada   :  { %2468 = vtanh.f32 %v2295_v30  ;;  %v1482_v27 = vmul.f32 0.5, %v2295_v30 }
0x1adb   :  { %2470 = vtanh.f32 %v1481_v8 }
0x1ae4   :  { %v2469_v6 = vpop.eup %2468 }
0x1ae5   :  { %1492 = vrot.lane.b32.xlu1 %v2469_v6, %s2608_s20  ;;  %v2471_v46 = vpop.eup %2470 }
0x1ae6   :  { %v1485_v12 = vmul.f32 0.5, %v2471_v46 }
0x1ae8   :  { %v1487_v21 = vadd.f32 0.5, %v1485_v12 }
0x1aea   :  { %v1490_v14 = vmul.f32 %v1487_v21, %v3223_v39  ;;  %v3325_v39 = vld [vmem:[%s3486_s4 + $0x4] ss:$8 sps:$4 sm:$0xff]  }
0x1b57   :  { %v1493_v60 = vpop.permute.xlu1 %1492 }
0x1b58   :  { %v1495_v59 = vmul.f32 %v1493_v60, %v1487_v21 }
0x1b5a   :  { %1497 = vrot.lane.b32.xlu0 %v1495_v59, %s2608_s20 }
0x1bcc   :  { %v1498_v54 = vpop.permute.xlu0 %1497 }
0x1bcd   :  { %v3309_v58 = vadd.f32 %v1498_v54, %v1490_v14 }
0x1bcf   :  { %2472 = vtanh.f32 %v3309_v58 }
0x1bd0   :  { %2474 = vtanh.f32 %v1482_v27 }
0x1bd9   :  { %v2473_v41 = vpop.eup %2472 }
0x1bda   :  { %1503 = vrot.lane.b32.xlu1 %v2473_v41, %s2608_s20  ;;  %v2475_v28 = vpop.eup %2474 }
0x1bdb   :  { %v1486_v45 = vmul.f32 0.5, %v2475_v28 }
0x1bdd   :  { %v1488_v61 = vadd.f32 0.5, %v1486_v45 }
0x1c4c   :  { %v1504_v48 = vpop.permute.xlu1 %1503 }
0x1c4d   :  { %v1506_v49 = vmul.f32 %v1504_v48, %v1488_v61 }
0x1c4f   :  { %v1507_v42 = vpack.c.bf16 %v1506_v49, %v1506_v49 }
0x1c51   :  { %2197 = vmatmul.mubr.msk.bf16.vlgmr.msra.gmra.mrb[24].mxu1 %vm301_vm2, %v1507_v42 }
0x1c52   :  { %1555 = vmatpush1.bf16.msra.mxu1 %v3231_v25  ;;  %1586 = vmatprep.mubr.bf16.mxu1 %v2607_v1 }
0x1c53   :  { %1556 = vmatprep.subr.bf16.mxu1 %v3238_v62 }
0x1c56   :  { %1557 = vmatpush1.bf16.msra.mxu1 %v3244_v40 }
0x1c57   :  { %1558 = vmatprep.subr.bf16.mxu1 %v3250_v43 }
0x1c5a   :  { %1559 = vmatpush1.bf16.msra.mxu1 %v3256_v38 }
0x1c5b   :  { %1560 = vmatprep.subr.bf16.mxu1 %v3262_v37 }
0x1c5e   :  { %1561 = vmatpush1.bf16.msra.mxu1 %v3268_v3 }
0x1c5f   :  { %1625 = vmatprep.subr.bf16.mxu1 %v3325_v39 }
0x1c61   :  { %2198 = vmatmul.mubr.msk.bf16.vlgmr.msra.gmra.mrb[28].mxu1 %vm301_vm2, %v1436_v17 }
0x1c62   :  { %1626 = vmatpush1.bf16.msra.mxu1 %v3332_v50  ;;  %1657 = vmatprep.mubr.bf16.mxu1 %v2607_v1 }
0x1c63   :  { %1627 = vmatprep.subr.bf16.mxu1 %v3339_v44 }
0x1c66   :  { %1628 = vmatpush1.bf16.msra.mxu1 %v3345_v51 }
0x1c67   :  { %1629 = vmatprep.subr.bf16.mxu1 %v3351_v4 }
0x1c6a   :  { %1630 = vmatpush1.bf16.msra.mxu1 %v3357_v52 }
0x1c6b   :  { %1631 = vmatprep.subr.bf16.mxu1 %v3363_v53 }
0x1c6e   :  { %1632 = vmatpush1.bf16.msra.mxu1 %v3369_v55 }
0x1d34   :  { %v1588_v5 = vpop.f32.mrb[28].mxu1 }
0x1d35   :  { %v1589_v29 = vadd.f32 %v1588_v5, %v217_v57  ;;  %v1590_v63 = vpop.f32.mrb[29].mxu1 }
0x1d36   :  { %v1591_v0 = vadd.f32 %v1590_v63, %v219_v15  ;;  %v1592_v26 = vpop.f32.mrb[30].mxu1 }
0x1d37   :  { %v1593_v34 = vpop.f32.mrb[31].mxu1  ;;  %v1595_v2 = vmul.f32 0.5, %v1589_v29 }
0x1d38   :  { %2476 = vtanh.f32 %v1591_v0  ;;  %v1596_v30 = vmul.f32 0.5, %v1591_v0 }
0x1d39   :  { %2478 = vtanh.f32 %v1595_v2 }
0x1d42   :  { %v2477_v36 = vpop.eup %2476 }
0x1d43   :  { %1606 = vrot.lane.b32.xlu0 %v2477_v36, %s2608_s20  ;;  %v2479_v10 = vpop.eup %2478 }
0x1d44   :  { %v1599_v47 = vmul.f32 0.5, %v2479_v10 }
0x1d46   :  { %v1601_v56 = vadd.f32 0.5, %v1599_v47 }
0x1d48   :  { %v1604_v11 = vmul.f32 %v1601_v56, %v3290_v33 }
0x1db5   :  { %v1607_v16 = vpop.permute.xlu0 %1606 }
0x1db6   :  { %v1609_v9 = vmul.f32 %v1607_v16, %v1601_v56 }
0x1db8   :  { %1611 = vrot.lane.b32.xlu1 %v1609_v9, %s2608_s20 }
0x1e2a   :  { %v1612_v17 = vpop.permute.xlu1 %1611 }
0x1e2b   :  { %v3379_v24 = vadd.f32 %v1612_v17, %v1604_v11 }
0x1e2d   :  { %2480 = vtanh.f32 %v3379_v24 }
0x1e2e   :  { %2482 = vtanh.f32 %v1596_v30 }
0x1e37   :  { %v2481_v18 = vpop.eup %2480 }
0x1e38   :  { %1617 = vrot.lane.b32.xlu0 %v2481_v18, %s2608_s20  ;;  %v2483_v19 = vpop.eup %2482 }
0x1e39   :  { %v1600_v20 = vmul.f32 0.5, %v2483_v19 }
0x1e3b   :  { %v1602_v6 = vadd.f32 0.5, %v1600_v20 }
0x1eaa   :  { %v1618_v7 = vpop.permute.xlu0 %1617 }
0x1eab   :  { %v1620_v8 = vmul.f32 %v1618_v7, %v1602_v6 }
0x1ead   :  { %v1621_v46 = vpack.c.bf16 %v1620_v8, %v1620_v8 }
0x1eaf   :  { %2199 = vmatmul.mubr.msk.bf16.vlgmr.msra.gmra.mrb[24].mxu1 %vm301_vm2, %v1621_v46 }
0x1f82   :  { %v1659_v12 = vpop.f32.mrb[24].mxu1 }
0x1f83   :  { %v1661_v33 = vpop.f32.mrb[25].mxu1  ;;  %v2296_v54 = vadd.f32 %v1659_v12, %v2931_v35 }
0x1f84   :  { %v2297_v21 = vadd.f32 %v1661_v33, %v2925_v13  ;;  %v1663_v60 = vpop.f32.mrb[26].mxu1  ;;  %v1878_v33 = vld [vmem:[%s3489_s7 + $0x8] sm:$0xff] }
0x1f85   :  { %v1664_v59 = vpop.f32.mrb[27].mxu1  ;;  %v1666_v41 = vmul.f32 0.5, %v2296_v54  ;;  %v1881_v54 = vld [vmem:[%s3489_s7 + $0x20] sm:$0xff] }
0x1f86   :  { %2484 = vtanh.f32 %v2297_v21  ;;  %v1667_v5 = vmul.f32 0.5, %v2297_v21  ;;  %v2609_v21 = vmov 0.0|0.0   ;;  %v1880_v59 = vld [vmem:[%s3489_s7 + $0x18] sm:$0xff] }
0x1f87   :  { %2486 = vtanh.f32 %v1666_v41  ;;  %2263 = vmatprep.subr.bf16.mxu1 %v2609_v21  ;;  %v1882_v41 = vld [vmem:[%s3489_s7 + $0x28] sm:$0xff] }
0x1f90   :  { %v2485_v14 = vpop.eup %2484 }
0x1f91   :  { %1677 = vrot.lane.b32.xlu1 %v2485_v14, %s2608_s20  ;;  %v2487_v27 = vpop.eup %2486 }
0x1f92   :  { %v1670_v28 = vmul.f32 0.5, %v2487_v27  ;;  %v2270_v27 = vpack.c.bf16 %v1882_v41, %v1881_v54 }
0x1f94   :  { %v1672_v45 = vadd.f32 0.5, %v1670_v28  ;;  %v1883_v28 = vld [vmem:[%s3489_s7 + $0x30] sm:$0xff] }
0x1f96   :  { %v1675_v49 = vmul.f32 %v1672_v45, %v3309_v58 }
0x2003   :  { %v1678_v61 = vpop.permute.xlu1 %1677 }
0x2004   :  { %v1680_v48 = vmul.f32 %v1678_v61, %v1672_v45  ;;  %v1884_v45 = vld [vmem:[%s3489_s7 + $0x38] sm:$0xff] }
0x2005   :  { %v2273_v61 = vpack.c.bf16 %v1884_v45, %v1883_v28 }
0x2006   :  { %1682 = vrot.lane.b32.xlu0 %v1680_v48, %s2608_s20 }
0x2078   :  { %v1683_v42 = vpop.permute.xlu0 %1682 }
0x2079   :  { %v3389_v57 = vadd.f32 %v1683_v42, %v1675_v49 }
0x207b   :  { %2488 = vtanh.f32 %v3389_v57 }
0x207c   :  { %2490 = vtanh.f32 %v1667_v5 }
0x2085   :  { %v2489_v15 = vpop.eup %2488 }
0x2086   :  { %1688 = vrot.lane.b32.xlu1 %v2489_v15, %s2608_s20  ;;  %v2491_v29 = vpop.eup %2490  ;;  %v2611_v15 = vmov 0.0  }
0x2087   :  { %v1671_v63 = vmul.f32 0.5, %v2491_v29  ;;  %2242 = vmatprep.mubr.msk.f32.mxu1 %vm2610_vm3, %v2611_v15 }
0x2089   :  { %v1673_v0 = vadd.f32 0.5, %v1671_v63 }
0x20f8   :  { %v1689_v26 = vpop.permute.xlu1 %1688 }
0x20f9   :  { %v1691_v34 = vmul.f32 %v1689_v26, %v1673_v0  ;;  %v1967_v26 = vld [vmem:[%s3491_s9 + $0x8] sm:$0xff] }
0x20fb   :  { %v1692_v36 = vpack.c.bf16 %v1691_v34, %v1691_v34 }
0x20fd   :  { %2200 = vmatmul.mubr.msk.bf16.vlgmr.msra.gmra.mrb[40].mxu0 %vm301_vm2, %v1692_v36 }
0x20fe   :  { %1740 = vmatpush1.bf16.msra.mxu0 %v3231_v25  ;;  %1771 = vmatprep.mubr.bf16.mxu0 %v2607_v1  ;;  %v221_v25 = vadd.f32 %v2974_v22, %v2847_v31 }
0x20ff   :  { %1741 = vmatprep.subr.bf16.mxu0 %v3238_v62  ;;  %v223_v62 = vadd.f32 %v2976_v23, %v2851_v32 }
0x2102   :  { %1742 = vmatpush1.bf16.msra.mxu0 %v3244_v40 }
0x2103   :  { %1743 = vmatprep.subr.bf16.mxu0 %v3250_v43 }
0x2106   :  { %1744 = vmatpush1.bf16.msra.mxu0 %v3256_v38 }
0x2107   :  { %1745 = vmatprep.subr.bf16.mxu0 %v3262_v37 }
0x210a   :  { %1746 = vmatpush1.bf16.msra.mxu0 %v3268_v3 }
0x210b   :  { %1810 = vmatprep.subr.bf16.mxu0 %v3325_v39 }
0x210d   :  { %2201 = vmatmul.mubr.msk.bf16.vlgmr.msra.gmra.mrb[44].mxu0 %vm301_vm2, %v1621_v46 }
0x210e   :  { %1811 = vmatpush1.bf16.msra.mxu0 %v3332_v50  ;;  %1842 = vmatprep.mubr.bf16.mxu0 %v2607_v1 }
0x210f   :  { %1812 = vmatprep.subr.bf16.mxu0 %v3339_v44 }
0x2112   :  { %1813 = vmatpush1.bf16.msra.mxu0 %v3345_v51 }
0x2113   :  { %1814 = vmatprep.subr.bf16.mxu0 %v3351_v4 }
0x2116   :  { %1815 = vmatpush1.bf16.msra.mxu0 %v3357_v52 }
0x2117   :  { %1816 = vmatprep.subr.bf16.mxu0 %v3363_v53 }
0x211a   :  { %1817 = vmatpush1.bf16.msra.mxu0 %v3369_v55 }
0x211b   :  { %2281 = vmatprep.subr.bf16.mxu0 %v2609_v21 }
0x21e0   :  { %v1773_v40 = vpop.f32.mrb[44].mxu0 }
0x21e1   :  { %v1774_v1 = vadd.f32 %v1773_v40, %v221_v25  ;;  %v1775_v43 = vpop.f32.mrb[45].mxu0  ;;  %v1968_v40 = vld [vmem:[%s3491_s9 + $0x10] sm:$0xff] }
0x21e2   :  { %v1776_v38 = vadd.f32 %v1775_v43, %v223_v62  ;;  %v1777_v37 = vpop.f32.mrb[46].mxu0 }
0x21e3   :  { %v1778_v3 = vpop.f32.mrb[47].mxu0  ;;  %v1780_v39 = vmul.f32 0.5, %v1774_v1  ;;  %v1969_v1 = vld [vmem:[%s3491_s9 + $0x18] sm:$0xff]  ;;  %v2053_v37 = vld [vmem:[%s3493_s11 + $0x8] sm:$0xff] }
0x21e4   :  { %2492 = vtanh.f32 %v1776_v38  ;;  %v1781_v53 = vmul.f32 0.5, %v1776_v38  ;;  %v2279_v43 = vpack.c.bf16 %v1969_v1, %v1968_v40  ;;  %v2052_v38 = vld [vmem:[%s3493_s11] sm:$0xff] }
0x21e5   :  { %2494 = vtanh.f32 %v1780_v39  ;;  %v2282_v3 = vpack.c.bf16 %v2053_v37, %v2052_v38 }
0x21ee   :  { %v2493_v58 = vpop.eup %2492 }
0x21ef   :  { %1791 = vrot.lane.b32.xlu0 %v2493_v58, %s2608_s20  ;;  %v2495_v50 = vpop.eup %2494  ;;  %v2203_v58 = vld [vmem:[%s3490_s8] ss:$0 sm:$0xff] }
0x21f0   :  { %v1784_v44 = vmul.f32 0.5, %v2495_v50 }
0x21f2   :  { %v1786_v51 = vadd.f32 0.5, %v1784_v44 }
0x21f4   :  { %v1789_v32 = vmul.f32 %v1786_v51, %v3379_v24 }
0x2261   :  { %v1792_v4 = vpop.permute.xlu0 %1791 }
0x2262   :  { %v1794_v31 = vmul.f32 %v1792_v4, %v1786_v51  ;;  %v2205_v4 = vld [vmem:[%s3492_s10] ss:$0 sm:$0xff] }
0x2264   :  { %1796 = vrot.lane.b32.xlu1 %v1794_v31, %s2608_s20 }
0x22d6   :  { %v1797_v22 = vpop.permute.xlu1 %1796 }
0x22d7   :  { %v1799_v23 = vadd.f32 %v1797_v22, %v1789_v32 }
0x22d9   :  { %2496 = vtanh.f32 %v1799_v23 }
0x22da   :  { %2498 = vtanh.f32 %v1781_v53 }
0x22e3   :  { %v2497_v52 = vpop.eup %2496 }
0x22e4   :  { %1802 = vrot.lane.b32.xlu0 %v2497_v52, %s2608_s20  ;;  %v2499_v55 = vpop.eup %2498  ;;  %v2207_v52 = vld [vmem:[#allocation3] ss:$0 sm:$0xff] }
0x22e5   :  { %v1785_v2 = vmul.f32 0.5, %v2499_v55 }
0x22e7   :  { %v1787_v10 = vadd.f32 0.5, %v1785_v2 }
0x2356   :  { %v1803_v47 = vpop.permute.xlu0 %1802 }
0x2357   :  { %v1805_v56 = vmul.f32 %v1803_v47, %v1787_v10 }
0x2359   :  { %v1806_v16 = vpack.c.bf16 %v1805_v56, %v1805_v56 }
0x235b   :  { %2202 = vmatmul.mubr.msk.bf16.vlgmr.msra.gmra.mrb[40].mxu0 %vm301_vm2, %v1806_v16 }
0x235c   :  { %2260 = vmatprep.mubr.msk.f32.mxu0 %vm2610_vm3, %v2611_v15  ;;  %2283 = vmatpush3.bf16.msra.mxu0 %v2282_v3 }
0x242e   :  { %v1844_v9 = vpop.f32.mrb[40].mxu0 }
0x242f   :  { %v1846_v11 = vpop.f32.mrb[41].mxu0  ;;  %v2298_v19 = vadd.f32 %v1844_v9, %v2931_v35  ;;  %v1879_v35 = vld [vmem:[%s3489_s7 + $0x10] sm:$0xff] }
0x2430   :  { %v2299_v17 = vadd.f32 %v1846_v11, %v2925_v13  ;;  %v1848_v24 = vpop.f32.mrb[42].mxu0  ;;  %v1877_v13 = vld [vmem:[%s3489_s7] sm:$0xff]  ;;  %v2267_v14 = vpack.c.bf16 %v1880_v59, %v1879_v35 }
0x2431   :  { %v1849_v18 = vpop.f32.mrb[43].mxu0  ;;  %v1851_v20 = vmul.f32 0.5, %v2298_v19  ;;  %v2264_v60 = vpack.c.bf16 %v1878_v33, %v1877_v13 }
0x2432   :  { %2500 = vtanh.f32 %v2299_v17  ;;  %v1852_v29 = vmul.f32 0.5, %v2299_v17 }
0x2433   :  { %2502 = vtanh.f32 %v1851_v20  ;;  %2265 = vmatpush3.bf16.msra.mxu1 %v2264_v60 }
0x2434   :  { %2266 = vmatprep.subr.bf16.mxu1 %v2609_v21 }
0x2437   :  { %2268 = vmatpush3.bf16.msra.mxu1 %v2267_v14 }
0x2438   :  { %2269 = vmatprep.subr.bf16.mxu1 %v2609_v21 }
0x243b   :  { %2271 = vmatpush3.bf16.msra.mxu1 %v2270_v27 }
0x243c   :  { %v2501_v30 = vpop.eup %2500  ;;  %2272 = vmatprep.subr.bf16.mxu1 %v2609_v21 }
0x243d   :  { %1862 = vrot.lane.b32.xlu1 %v2501_v30, %s2608_s20  ;;  %v2503_v6 = vpop.eup %2502 }
0x243e   :  { %v1855_v7 = vmul.f32 0.5, %v2503_v6 }
0x243f   :  { %2274 = vmatpush3.bf16.msra.mxu1 %v2273_v61 }
0x2440   :  { %v1857_v8 = vadd.f32 0.5, %v1855_v7  ;;  %2275 = vmatprep.subr.bf16.mxu1 %v2609_v21 }
0x2442   :  { %v1860_v48 = vmul.f32 %v1857_v8, %v3389_v57  ;;  %v1966_v57 = vld [vmem:[%s3491_s9] sm:$0xff] }
0x2443   :  { %v2276_v25 = vpack.c.bf16 %v1967_v26, %v1966_v57 }
0x24af   :  { %v1863_v46 = vpop.permute.xlu1 %1862 }
0x24b0   :  { %v1865_v12 = vmul.f32 %v1863_v46, %v1857_v8 }
0x24b2   :  { %1867 = vrot.lane.b32.xlu0 %v1865_v12, %s2608_s20 }
0x2524   :  { %v1868_v49 = vpop.permute.xlu0 %1867 }
0x2525   :  { %v1870_v42 = vadd.f32 %v1868_v49, %v1860_v48 }
0x2527   :  { %2504 = vtanh.f32 %v1870_v42 }
0x2528   :  { %2506 = vtanh.f32 %v1852_v29 }
0x2531   :  { %v2505_v5 = vpop.eup %2504 }
0x2532   :  { %1873 = vrot.lane.b32.xlu1 %v2505_v5, %s2608_s20  ;;  %v2507_v63 = vpop.eup %2506 }
0x2533   :  { %v1856_v0 = vmul.f32 0.5, %v2507_v63 }
0x2535   :  { %v1858_v34 = vadd.f32 0.5, %v1856_v0 }
0x25a4   :  { %v1874_v36 = vpop.permute.xlu1 %1873 }
0x25a5   :  { %v1876_v62 = vmul.f32 %v1874_v36, %v1858_v34 }
0x25a7   :  { %2243 = vmatmul.mubr.msk.f32.vlgmr.msra.gmra.mrb[32].mxu1 %vm301_vm2, %v1876_v62 }
0x25a8   :  { %2277 = vmatpush3.bf16.msra.mxu1 %v2276_v25  ;;  %2253 = vmatprep.mubr.msk.f32.mxu1 %vm2610_vm3, %v2611_v15 }
0x25a9   :  { %2278 = vmatprep.subr.bf16.mxu1 %v2609_v21 }
0x25ac   :  { %2280 = vmatpush3.bf16.msra.mxu1 %v2279_v43 }
0x267a   :  { %v1961_v39 = vpop.f32.mrb[32].mxu1 }
0x267b   :  { %v1962_v50 = vadd.f32 %v2203_v58, %v1961_v39  ;;  %v2244_v44 = vpop.f32.mrb[33].mxu1 }
0x267d   :  { %v1965_v51 = vmax.f32 %v1962_v50, 0.0 }
0x267f   :  { %2254 = vmatmul.mubr.msk.f32.vlgmr.msra.gmra.mrb[34].mxu1 %vm1977_vm4, %v1965_v51 }
0x2752   :  { %v2047_v31 = vpop.f32.mrb[34].mxu1 }
0x2753   :  { %v2048_v32 = vadd.f32 %v2205_v4, %v2047_v31  ;;  %v2255_v22 = vpop.f32.mrb[35].mxu1 }
0x2755   :  { %v2051_v23 = vmax.f32 %v2048_v32, 0.0 }
0x2757   :  { %2261 = vmatmul.mubr.msk.f32.vlgmr.msra.gmra.mrb[48].mxu0 %vm2061_vm5, %v2051_v23 }
0x282a   :  { %v2131_v53 = vpop.f32.mrb[48].mxu0 }
0x282b   :  { %v2132_v55 = vadd.f32 %v2207_v52, %v2131_v53  ;;  %v2262_v2 = vpop.f32.mrb[49].mxu0 }
0x282d   :  { %v2135_v10 = vmul.f32 0.5, %v2132_v55 }
0x282f   :  { %2508 = vtanh.f32 %v2135_v10 }
0x2839   :  { %v2509_v47 = vpop.eup %2508 }
0x283a   :  { %v2137_v56 = vmul.f32 0.5, %v2509_v47 }
0x283c   :  { %v2138_v16 = vadd.f32 0.5, %v2137_v56 }
0x283e   :  { %2140 = vst.msk [vmem:[%s3495_s13] sm:$0xff] %vm2139_vm6, %v2138_v16 }
0x283f   :  { %2145 = vsyncpa [#allocation5], 1 }
0x2840   :  { %2146 = vsyncpa [#allocation7], 1 }

</bundles_post_ra>
